<compile_context>
chip_gen: v7x
topology: tpu7x:2x2x1
jax: 0.10.0
libtpu: 0.0.40
codegen_flags: <defaults>
</compile_context>

<pallas_src>
import functools
import math

import jax
import jax.numpy as jnp
from jax.experimental import pallas as pl
from jax.experimental.pallas import tpu as pltpu


# ----------------------------------------------------------------------------- config
def _vmem_limit_bytes():
    # ~80% of physical VMEM (=~51 MiB on v7x, ~102 MiB on v5e/v6e); conservative fallback.
    try:
        cap = getattr(pltpu.get_tpu_info(), "vmem_capacity_bytes", None)
        if cap:
            return int(cap * 0.8)
    except Exception:
        pass
    return 64 * 1024 * 1024


_VMEM_LIMIT = _vmem_limit_bytes()


def _cparams(*sem):
    return pltpu.CompilerParams(dimension_semantics=sem, vmem_limit_bytes=_VMEM_LIMIT)


# ----------------------------------------------------------------------------- helpers
def _erf(x):
    # Abramowitz & Stegun 7.1.26 rational approximation (max abs err ~1.5e-7), exp-only.
    a1, a2, a3, a4, a5 = 0.254829592, -0.284496736, 1.421413741, -1.453152027, 1.061405429
    p = 0.3275911
    ax = jnp.abs(x)
    t = 1.0 / (1.0 + p * ax)
    poly = ((((a5 * t + a4) * t + a3) * t + a2) * t + a1) * t
    y = 1.0 - poly * jnp.exp(-ax * ax)
    return jnp.where(x >= 0, y, -y)


def _h_tile(H, W, C, budget_bytes=8 << 20):
    """Largest multiple-of-8 divisor of H whose dwconv working set fits the budget."""
    per_row = (W + 8) * C * 4 * 4          # window + rolled copy + acc + slack (f32)
    best = 8
    for cand in range(8, H + 1, 8):
        if H % cand == 0 and (cand + 6) * per_row <= budget_bytes:
            best = cand
    return best


def _row_tile(m, target=1024):
    """Largest multiple-of-8 divisor of m that is <= target (never falls back to full m)."""
    best = min(m, 8)
    for t in range(8, min(m, target) + 1, 8):
        if m % t == 0:
            best = t
    return best


# ----------------------------------------------------------------------------- kernels
def dwconv_stats_kernel(body_ref, halo_ref, dw_w_ref, dw_b_ref, dout_ref, stats_ref,
                        *, TH, W, Wp, C):
    # Depthwise 7x7 conv on an H-tile (+6-row halo) of the W/H pre-padded input, plus
    # per-(sample, H-tile) partial BN sums.  No boundary masks: the input is pre-padded,
    # so each kw tap is a sublane roll + aligned prefix slice.
    halo = halo_ref[0, 0]
    xwin = jnp.concatenate([body_ref[0, 0], halo[:6]], axis=0)      # (TH+6, Wp, C)
    acc = jnp.zeros((TH, W, C), jnp.float32)
    for kw in range(7):
        sh = xwin if kw == 0 else pltpu.roll(xwin, shift=(Wp - kw) % Wp, axis=1)
        shw = sh[:, :W, :]                                          # aligned prefix slice
        for kh in range(7):
            acc = acc + shw[kh:kh + TH] * dw_w_ref[kh, kw]          # (1, C) tap broadcast
    acc = acc + dw_b_ref[...]
    dout_ref[0, 0] = acc.astype(dout_ref.dtype)                     # bf16 HBM round-trip
    s1 = jnp.sum(jnp.sum(acc, axis=0), axis=0, keepdims=True)       # (1, C)
    s2 = jnp.sum(jnp.sum(acc * acc, axis=0), axis=0, keepdims=True)
    stats_ref[0, 0, 0] = jnp.concatenate([s1, s2], axis=0)          # (2, C)


def bn_pwconv1_gelu_kernel(dout_ref, scale_ref, shift_ref, w1_ref, b1_ref, h_ref, gsq_ref):
    # Row-tiled: BN apply (folded scale/shift) + pwconv1 + erf GELU + partial GRN sums.
    z = dout_ref[0, 0].astype(jnp.float32) * scale_ref[0] + shift_ref[0]   # (TR, C)
    h = jnp.dot(z.astype(jnp.bfloat16), w1_ref[...],
                preferred_element_type=jnp.float32) + b1_ref[...]          # (TR, 4C)
    h = 0.5 * h * (1.0 + _erf(h * 0.7071067811865476))
    h_ref[0, 0] = h.astype(jnp.bfloat16)
    gsq_ref[0, 0, 0] = jnp.sum(h * h, axis=0, keepdims=True)               # (1, 4C)


def grn_pwconv2_conv_kernel(h_ref, xres_ref, nx_ref, grn_g_ref, grn_b_ref,
                            w2_ref, b2_ref, convw_ref, out_ref, c_ref):
    # Row-tiled: GRN apply + pwconv2 + residual, fused with the convx/convy 1x1 conv
    # (xres is already resident, so the input is not re-read by a separate kernel).
    h = h_ref[0, 0].astype(jnp.float32)                                    # (TR, 4C)
    hg = grn_g_ref[...] * (h * nx_ref[0, 0]) + grn_b_ref[...] + h
    o = jnp.dot(hg.astype(jnp.bfloat16), w2_ref[...],
                preferred_element_type=jnp.float32) + b2_ref[...]
    xres = xres_ref[0, 0]
    out_ref[0, 0] = xres + o                                               # DropPath(0) = id
    c_ref[0, 0] = jnp.dot(xres.astype(jnp.bfloat16), convw_ref[0],
                          preferred_element_type=jnp.float32)


def cross_attn_kernel(q_in_ref, kv_in_ref, wq_ref, bq_ref, wkv_ref, bkv_ref, o_ref, *, d):
    # 1/sqrt(d) already folded into the q projection; k/v come from one fused projection.
    x = q_in_ref[0, 0].astype(jnp.bfloat16)                   # (N, d)
    y = kv_in_ref[0, 0].astype(jnp.bfloat16)
    q = jnp.dot(x, wq_ref[0], preferred_element_type=jnp.float32) + bq_ref[0]
    kv = jnp.dot(y, wkv_ref[0], preferred_element_type=jnp.float32) + bkv_ref[0]
    k = kv[:, :d]
    v = kv[:, d:]
    s = jax.lax.dot_general(q.astype(jnp.bfloat16), k.astype(jnp.bfloat16),
                            (((1,), (1,)), ((), ())),
                            preferred_element_type=jnp.float32)            # (N, N)
    s = s - jnp.max(s, axis=-1, keepdims=True)
    e = jnp.exp(s)
    p = e * pl.reciprocal(jnp.sum(e, axis=-1, keepdims=True), approx=True)  # EUP divide
    o_ref[0, 0] = jnp.dot(p.astype(jnp.bfloat16), v.astype(jnp.bfloat16),
                          preferred_element_type=jnp.float32)


def spatial_attn_kernel(z_ref, w_ref, o_ref, *, Hh, Wh):
    # One un-gridded step over all B.  Planar layout: lanes carry Wh, the 2 conv-in
    # channels sit on sublanes; output (B, Hh, Wh).
    z = z_ref[...]                                            # (B, Hh+6, 2, Wh+6)
    Bn = z.shape[0]
    acc = jnp.zeros((Bn, Hh, 2, Wh), jnp.float32)
    for kw in range(7):
        zw = z[:, :, :, kw:kw + Wh]
        for kh in range(7):
            acc = acc + zw[:, kh:kh + Hh] * w_ref[kh, kw]     # w tap: (2, 1)
    o_ref[...] = jax.nn.sigmoid(jnp.sum(acc, axis=2))


def epilogue_kernel(idwt_ref, blk_ref, w_ref, o_ref):
    # Fused iconvx/iconvy + wx/wy blend + residual add (weights pre-scaled in glue):
    #   xo = blockx + idwtx @ (iconvx*wx)     + idwty @ (iconvy*(1-wx))
    #   yo = blocky + idwty @ (iconvy*wy)     + idwtx @ (iconvx*(1-wy))
    ix = idwt_ref[0].astype(jnp.bfloat16)                     # (tm, d4)
    iy = idwt_ref[1].astype(jnp.bfloat16)
    o_ref[0] = blk_ref[0] + (jnp.dot(ix, w_ref[0], preferred_element_type=jnp.float32)
                             + jnp.dot(iy, w_ref[1], preferred_element_type=jnp.float32))
    o_ref[1] = blk_ref[1] + (jnp.dot(iy, w_ref[3], preferred_element_type=jnp.float32)
                             + jnp.dot(ix, w_ref[2], preferred_element_type=jnp.float32))


# ----------------------------------------------------------------------------- wrappers
def convnext_block_pair(xy, p):
    """ConvNeXtV2 Block (shared weights) on both stacked inputs + fused convx/convy.

    xy: (2, B, H, W, C).  Returns (block_out (2,B,H,W,C), conv_out (2,B,H,W,C//4)).
    BN batch statistics are computed per leading index (training-mode, biased variance),
    matching two separate PyTorch forward() calls.  GRN is two-pass so both heavy passes
    stay row-tiled (bounded VMEM on v7x's 64 MiB).
    """
    _, B, H, W, C = xy.shape
    d4 = C // 4
    HW = H * W
    dw_w = p['dw_w'].reshape(7, 7, 1, C)
    Wp = W + 8
    TH = _h_tile(H, W, C)
    n_h = H // TH

    # pre-pad H/W once in glue (3 + data + 5 -> multiples of 8): removes per-tap masking.
    xpad = jnp.pad(xy, ((0, 0), (0, 0), (3, 5), (3, 5), (0, 0)))

    # ---- pass 1: depthwise conv (H-tiled, body + 8-row halo specs) + partial BN sums
    dout, stats = pl.pallas_call(
        functools.partial(dwconv_stats_kernel, TH=TH, W=W, Wp=Wp, C=C),
        grid=(2, B, n_h),
        in_specs=[
            pl.BlockSpec((1, 1, TH, Wp, C), lambda c, b, h: (c, b, h, 0, 0)),
            pl.BlockSpec((1, 1, 8, Wp, C),
                         lambda c, b, h, TH8=TH // 8: (c, b, (h + 1) * TH8, 0, 0)),
            pl.BlockSpec((7, 7, 1, C), lambda c, b, h: (0, 0, 0, 0)),
            pl.BlockSpec((1, C), lambda c, b, h: (0, 0)),
        ],
        out_specs=[
            pl.BlockSpec((1, 1, TH, W, C), lambda c, b, h: (c, b, h, 0, 0)),
            pl.BlockSpec((1, 1, 1, 2, C), lambda c, b, h: (c, b, h, 0, 0)),
        ],
        out_shape=[jax.ShapeDtypeStruct((2, B, H, W, C), jnp.bfloat16),
                   jax.ShapeDtypeStruct((2, B, n_h, 2, C), jnp.float32)],
        compiler_params=_cparams("parallel", "parallel", "parallel"),
    )(xpad, xpad, dw_w, p['dw_b'])

    # ---- BN batch stats per call (training-mode, biased variance, clamped), eps=1e-6
    cnt = float(B * H * W)
    ssum = jnp.sum(stats, axis=(1, 2))                        # (2, 2, C)
    mean = ssum[:, 0, :] / cnt
    var = jnp.maximum(ssum[:, 1, :] / cnt - mean * mean, 0.0)
    inv = jax.lax.rsqrt(var + 1e-6)
    scale = (p['bn_g'] * inv).reshape(2, 1, C)
    shift = (p['bn_b'] - mean * (p['bn_g'] * inv)).reshape(2, 1, C)

    TR = _row_tile(HW)
    n_r = HW // TR
    dout2 = dout.reshape(2, B, HW, C)

    # ---- pass 2a: BN apply + pwconv1 + GELU + partial GRN sum(h^2)   (row-tiled)
    h2, gsq = pl.pallas_call(
        bn_pwconv1_gelu_kernel,
        grid=(2, B, n_r),
        in_specs=[
            pl.BlockSpec((1, 1, TR, C), lambda c, b, r: (c, b, r, 0)),
            pl.BlockSpec((1, 1, C), lambda c, b, r: (c, 0, 0)),
            pl.BlockSpec((1, 1, C), lambda c, b, r: (c, 0, 0)),
            pl.BlockSpec((C, 4 * C), lambda c, b, r: (0, 0)),
            pl.BlockSpec((1, 4 * C), lambda c, b, r: (0, 0)),
        ],
        out_specs=[
            pl.BlockSpec((1, 1, TR, 4 * C), lambda c, b, r: (c, b, r, 0)),
            pl.BlockSpec((1, 1, 1, 1, 4 * C), lambda c, b, r: (c, b, r, 0, 0)),
        ],
        out_shape=[jax.ShapeDtypeStruct((2, B, HW, 4 * C), jnp.bfloat16),
                   jax.ShapeDtypeStruct((2, B, n_r, 1, 4 * C), jnp.float32)],
        compiler_params=_cparams("parallel", "parallel", "parallel"),
    )(dout2, scale, shift, p['w1'].astype(jnp.bfloat16), p['b1'])

    # ---- GRN global factors (per call index & sample)
    gx = jnp.sqrt(jnp.sum(gsq, axis=(2, 3)))                  # (2, B, 4C)
    nx = (gx / (jnp.mean(gx, axis=-1, keepdims=True) + 1e-6)).reshape(2, B, 1, 4 * C)

    convw = jnp.stack([p['convx_w'], p['convy_w']], axis=0).astype(jnp.bfloat16)
    xres2 = xy.reshape(2, B, HW, C)

    # ---- pass 2b: GRN apply + pwconv2 + residual, fused convx/convy   (row-tiled)
    blk, conv = pl.pallas_call(
        grn_pwconv2_conv_kernel,
        grid=(2, B, n_r),
        in_specs=[
            pl.BlockSpec((1, 1, TR, 4 * C), lambda c, b, r: (c, b, r, 0)),
            pl.BlockSpec((1, 1, TR, C), lambda c, b, r: (c, b, r, 0)),
            pl.BlockSpec((1, 1, 1, 4 * C), lambda c, b, r: (c, b, 0, 0)),
            pl.BlockSpec((1, 4 * C), lambda c, b, r: (0, 0)),
            pl.BlockSpec((1, 4 * C), lambda c, b, r: (0, 0)),
            pl.BlockSpec((4 * C, C), lambda c, b, r: (0, 0)),
            pl.BlockSpec((1, C), lambda c, b, r: (0, 0)),
            pl.BlockSpec((1, C, d4), lambda c, b, r: (c, 0, 0)),
        ],
        out_specs=[
            pl.BlockSpec((1, 1, TR, C), lambda c, b, r: (c, b, r, 0)),
            pl.BlockSpec((1, 1, TR, d4), lambda c, b, r: (c, b, r, 0)),
        ],
        out_shape=[jax.ShapeDtypeStruct((2, B, HW, C), jnp.float32),
                   jax.ShapeDtypeStruct((2, B, HW, d4), jnp.float32)],
        compiler_params=_cparams("parallel", "parallel", "parallel"),
    )(h2, xres2, nx, p['grn_g'], p['grn_b'],
      p['w2'].astype(jnp.bfloat16), p['b2'], convw)

    return blk.reshape(2, B, H, W, C), conv.reshape(2, B, H, W, d4)


def cross_attention_pair(qin, kvin, wq, bq, wkv, bkv):
    # qin/kvin: (2, B, N, d).  Both CrossAttention modules fused (grid axis 0 picks weights).
    _, B, N, d = qin.shape
    kern = functools.partial(cross_attn_kernel, d=d)
    seq = pl.BlockSpec((1, 1, N, d), lambda c, b: (c, b, 0, 0))
    return pl.pallas_call(
        kern, grid=(2, B),
        in_specs=[seq, seq,
                  pl.BlockSpec((1, d, d), lambda c, b: (c, 0, 0)),
                  pl.BlockSpec((1, 1, d), lambda c, b: (c, 0, 0)),
                  pl.BlockSpec((1, d, 2 * d), lambda c, b: (c, 0, 0)),
                  pl.BlockSpec((1, 1, 2 * d), lambda c, b: (c, 0, 0))],
        out_specs=seq,
        out_shape=jax.ShapeDtypeStruct((2, B, N, d), jnp.float32),
        compiler_params=_cparams("parallel", "parallel"),
    )(qin, kvin, wq, bq, wkv, bkv)


def spatial_attention(avg, mx, w):
    # avg/mx: (B, Hh, Wh) channel mean / max planes; w: (7, 7, 2).  Output (B, Hh, Wh).
    B, Hh, Wh = avg.shape
    z = jnp.stack([avg, mx], axis=2)                          # (B, Hh, 2, Wh)
    z = jnp.pad(z, ((0, 0), (3, 3), (0, 0), (3, 3)))
    kern = functools.partial(spatial_attn_kernel, Hh=Hh, Wh=Wh)
    return pl.pallas_call(
        kern,
        out_shape=jax.ShapeDtypeStruct((B, Hh, Wh), jnp.float32),
        compiler_params=pltpu.CompilerParams(vmem_limit_bytes=_VMEM_LIMIT),
    )(z, w.reshape(7, 7, 2, 1))


def fusion_epilogue(idwt2, blk2, wep):
    # idwt2: (2, M, d4), blk2: (2, M, C), wep: (4, d4, C) bf16 -> (2, M, C)
    _, M, d4 = idwt2.shape
    C = blk2.shape[-1]
    tm = _row_tile(M)
    return pl.pallas_call(
        epilogue_kernel,
        grid=(M // tm,),
        in_specs=[pl.BlockSpec((2, tm, d4), lambda t: (0, t, 0)),
                  pl.BlockSpec((2, tm, C), lambda t: (0, t, 0)),
                  pl.BlockSpec((4, d4, C), lambda t: (0, 0, 0))],
        out_specs=pl.BlockSpec((2, tm, C), lambda t: (0, t, 0)),
        out_shape=jax.ShapeDtypeStruct((2, M, C), jnp.float32),
        compiler_params=_cparams("parallel"),
    )(idwt2, blk2, wep)


# Haar DWT / IDWT (wave='haar'): pure pixel de/interleave + cheap adds -> JAX glue.
def haar_dwt_nhwc(t):
    a = t[:, 0::2, 0::2, :]
    b = t[:, 0::2, 1::2, :]
    c = t[:, 1::2, 0::2, :]
    d = t[:, 1::2, 1::2, :]
    ll = 0.5 * (a + b + c + d)
    lh = 0.5 * (a + b - c - d)
    hl = 0.5 * (a - b + c - d)
    hh = 0.5 * (a - b - c + d)
    return ll, lh, hl, hh


def haar_idwt_nhwc(ll, lh, hl, hh):
    a = 0.5 * (ll + lh + hl + hh)
    b = 0.5 * (ll + lh - hl - hh)
    c = 0.5 * (ll - lh + hl - hh)
    d = 0.5 * (ll - lh - hl + hh)
    B, Hh, Wh, ch = ll.shape
    top = jnp.stack([a, b], axis=3).reshape(B, Hh, 2 * Wh, ch)
    bot = jnp.stack([c, d], axis=3).reshape(B, Hh, 2 * Wh, ch)
    return jnp.stack([top, bot], axis=2).reshape(B, 2 * Hh, 2 * Wh, ch)


# ----------------------------------------------------------------------------- forward
def fusion_block_forward(x, y, p):
    # x, y: (B, C, H, W) NCHW.  Stack x/y on a leading axis of 2 and go NHWC.
    xy = jnp.transpose(jnp.stack([x, y], axis=0), (0, 1, 3, 4, 2)).astype(jnp.float32)
    _, B, H, W, C = xy.shape
    assert H % 8 == 0 and W % 8 == 0 and C % 4 == 0
    d4 = C // 4
    Hh, Wh = H // 2, W // 2
    N = Hh * Wh
    M = B * H * W

    # self.blockx applied to both inputs + fused convx/convy.
    blk, conv = convnext_block_pair(xy, p)                    # (2,B,H,W,C), (2,B,H,W,d4)

    c4 = conv.reshape(2 * B, H, W, d4)
    ll, lh, hl, hh = haar_dwt_nhwc(c4)                        # each (2B, Hh, Wh, d4)

    # SpatialAttention over the 6 high-frequency subbands (channel mean/max in glue).
    hf = jnp.concatenate([lh, hl, hh], axis=-1).reshape(2, B, Hh, Wh, 3 * d4)
    avg = jnp.mean(hf, axis=(0, 4))
    mx = jnp.max(hf, axis=(0, 4))
    attn = spatial_attention(avg, mx, p['sattn_w'])           # (B, Hh, Wh)
    attn2 = (attn * attn)[:, :, :, None]                      # applied twice, as in reference

    llx = ll[:B] * attn2
    lly = ll[B:]
    qin = jnp.stack([llx.reshape(B, N, d4), lly.reshape(B, N, d4)], axis=0)
    kvin = jnp.stack([lly.reshape(B, N, d4), llx.reshape(B, N, d4)], axis=0)

    # 1/sqrt(d) folded into the q projection; wk/wv fused into one (d, 2d) projection.
    scale = 1.0 / math.sqrt(d4)
    wq = (jnp.stack([p['ax_wq'], p['ay_wq']]) * scale).astype(jnp.bfloat16)
    bq = jnp.stack([p['ax_bq'], p['ay_bq']]) * scale
    wkv = jnp.stack([jnp.concatenate([p['ax_wk'], p['ax_wv']], axis=1),
                     jnp.concatenate([p['ay_wk'], p['ay_wv']], axis=1)]).astype(jnp.bfloat16)
    bkv = jnp.stack([jnp.concatenate([p['ax_bk'], p['ax_bv']], axis=1),
                     jnp.concatenate([p['ay_bk'], p['ay_bv']], axis=1)])
    f = cross_attention_pair(qin, kvin, wq, bq, wkv, bkv)     # (2, B, N, d4)
    f4 = f.reshape(2 * B, Hh, Wh, d4)

    idwt = haar_idwt_nhwc(f4, lh, hl, hh)                     # (2B, H, W, d4)

    # Fused iconvx/iconvy + wx/wy blend + residual add (weights pre-scaled in glue).
    wx, wy = p['wx'], p['wy']
    wep = jnp.stack([p['iconvx_w'] * wx, p['iconvy_w'] * (1.0 - wx),
                     p['iconvx_w'] * (1.0 - wy), p['iconvy_w'] * wy],
                    axis=0).astype(jnp.bfloat16)              # (4, d4, C)
    out = fusion_epilogue(idwt.reshape(2, M, d4), blk.reshape(2, M, C), wep)

    out = out.reshape(2, B, H, W, C)
    xo = jnp.transpose(out[0], (0, 3, 1, 2))
    yo = jnp.transpose(out[1], (0, 3, 1, 2))
    return xo, yo


# ----------------------------------------------------------------------------- reference
def reference_forward(x, y, p):
    """Pure-JAX reference of the same forward semantics (training-mode BN, erf GELU,
    identical Haar convention).  Used only as a numerical self-check."""
    xh = jnp.transpose(x, (0, 2, 3, 1)).astype(jnp.float32)
    yh = jnp.transpose(y, (0, 2, 3, 1)).astype(jnp.float32)
    B, H, W, C = xh.shape
    d4 = C // 4
    Hh, Wh = H // 2, W // 2

    def dwconv(t):
        tp = jnp.pad(t, ((0, 0), (3, 3), (3, 3), (0, 0)))
        d = jnp.zeros_like(t)
        for kh in range(7):
            for kw in range(7):
                d = d + tp[:, kh:kh + H, kw:kw + W, :] * p['dw_w'][kh, kw]
        return d + p['dw_b'][0]

    def block(t):
        d = dwconv(t)
        mean = jnp.mean(d, axis=(0, 1, 2))
        var = jnp.mean((d - mean) ** 2, axis=(0, 1, 2))
        z = (d - mean) * jax.lax.rsqrt(var + 1e-6) * p['bn_g'][0] + p['bn_b'][0]
        h = z @ p['w1'] + p['b1'][0]
        h = 0.5 * h * (1.0 + jax.scipy.special.erf(h / jnp.sqrt(2.0)))
        gx = jnp.sqrt(jnp.sum(h * h, axis=(1, 2), keepdims=True))
        nx = gx / (jnp.mean(gx, axis=-1, keepdims=True) + 1e-6)
        h = p['grn_g'][0] * (h * nx) + p['grn_b'][0] + h
        return t + (h @ p['w2'] + p['b2'][0])

    bx, by = block(xh), block(yh)
    cx, cy = xh @ p['convx_w'], yh @ p['convy_w']
    llx, lhx, hlx, hhx = haar_dwt_nhwc(cx)
    lly, lhy, hly, hhy = haar_dwt_nhwc(cy)

    hf = jnp.concatenate([lhx, hlx, hhx, lhy, hly, hhy], axis=-1)
    sa_in = jnp.stack([jnp.mean(hf, axis=-1), jnp.max(hf, axis=-1)], axis=-1)
    sp = jnp.pad(sa_in, ((0, 0), (3, 3), (3, 3), (0, 0)))
    sa = jnp.zeros((B, Hh, Wh), jnp.float32)
    for kh in range(7):
        for kw in range(7):
            sa = sa + jnp.sum(sp[:, kh:kh + Hh, kw:kw + Wh, :] * p['sattn_w'][kh, kw], axis=-1)
    sa = jax.nn.sigmoid(sa)[..., None]
    llx = llx * sa * sa

    def xattn(qv, kvv, wq, bq, wk, bk, wv, bv):
        qf = qv.reshape(B, Hh * Wh, d4)
        kf = kvv.reshape(B, Hh * Wh, d4)
        q = qf @ wq + bq[0]
        k = kf @ wk + bk[0]
        v = kf @ wv + bv[0]
        s = jnp.einsum('bnd,bmd->bnm', q, k) / math.sqrt(d4)
        a = jax.nn.softmax(s, axis=-1)
        return (a @ v).reshape(B, Hh, Wh, d4)

    fx = xattn(llx, lly, p['ax_wq'], p['ax_bq'], p['ax_wk'], p['ax_bk'], p['ax_wv'], p['ax_bv'])
    fy = xattn(lly, llx, p['ay_wq'], p['ay_bq'], p['ay_wk'], p['ay_bk'], p['ay_wv'], p['ay_bv'])

    idx = haar_idwt_nhwc(fx, lhx, hlx, hhx) @ p['iconvx_w']
    idy = haar_idwt_nhwc(fy, lhy, hly, hhy) @ p['iconvy_w']
    xo = bx + idx * p['wx'] + idy * (1.0 - p['wx'])
    yo = by + idy * p['wy'] + idx * (1.0 - p['wy'])
    return jnp.transpose(xo, (0, 3, 1, 2)), jnp.transpose(yo, (0, 3, 1, 2))


# ----------------------------------------------------------------------------- params
def init_params(key, dim):
    d4 = dim // 4
    ks = jax.random.split(key, 28)

    def nrm(k, shape, s=0.1):
        return (s * jax.random.normal(k, shape)).astype(jnp.float32)

    p = {
        # Block(dim)
        'dw_w': nrm(ks[0], (7, 7, dim)),            # depthwise 7x7, groups=dim
        'dw_b': nrm(ks[1], (1, dim)),
        'bn_g': 1.0 + nrm(ks[2], (1, dim)),         # BatchNorm2d affine
        'bn_b': nrm(ks[3], (1, dim)),
        'w1': nrm(ks[4], (dim, 4 * dim)),           # pwconv1 (Linear dim -> 4*dim)
        'b1': nrm(ks[5], (1, 4 * dim)),
        'grn_g': nrm(ks[6], (1, 4 * dim)),          # GRN gamma/beta
        'grn_b': nrm(ks[7], (1, 4 * dim)),
        'w2': nrm(ks[8], (4 * dim, dim)),           # pwconv2 (Linear 4*dim -> dim)
        'b2': nrm(ks[9], (1, dim)),
        # 1x1 convs (bias=False)
        'convx_w': nrm(ks[10], (dim, d4)),
        'convy_w': nrm(ks[11], (dim, d4)),
        'iconvx_w': nrm(ks[12], (d4, dim)),
        'iconvy_w': nrm(ks[13], (d4, dim)),
        # fusion weights
        'wx': jnp.float32(0.5),
        'wy': jnp.float32(0.5),
        # CrossAttention x  (kv Linear split into k / v halves)
        'ax_wq': nrm(ks[14], (d4, d4)), 'ax_bq': nrm(ks[15], (1, d4)),
        'ax_wk': nrm(ks[16], (d4, d4)), 'ax_bk': nrm(ks[17], (1, d4)),
        'ax_wv': nrm(ks[18], (d4, d4)), 'ax_bv': nrm(ks[19], (1, d4)),
        # CrossAttention y
        'ay_wq': nrm(ks[20], (d4, d4)), 'ay_bq': nrm(ks[21], (1, d4)),
        'ay_wk': nrm(ks[22], (d4, d4)), 'ay_bk': nrm(ks[23], (1, d4)),
        'ay_wv': nrm(ks[24], (d4, d4)), 'ay_bv': nrm(ks[25], (1, d4)),
        # SpatialAttention 7x7 conv (2 -> 1, no bias)
        'sattn_w': nrm(ks[26], (7, 7, 2)),
    }
    return p


# ----------------------------------------------------------------------------- main
if __name__ == "__main__":
    B, C, H, W = 2, 32, 16, 16
    key = jax.random.PRNGKey(0)
    kx, ky, kp = jax.random.split(key, 3)
    x = jax.random.normal(kx, (B, C, H, W), jnp.float32)
    y = jax.random.normal(ky, (B, C, H, W), jnp.float32)
    params = init_params(kp, C)

    xo, yo = jax.jit(fusion_block_forward)(x, y, params)
    jax.block_until_ready(xo)
    jax.block_until_ready(yo)

    assert xo.shape == (B, C, H, W) and yo.shape == (B, C, H, W)
    assert bool(jnp.all(jnp.isfinite(xo))) and bool(jnp.all(jnp.isfinite(yo)))

    # Numerical self-check vs. a pure-JAX reference (loose tolerance: bf16 MXU operands,
    # bf16 intermediates and the approx softmax reciprocal in the Pallas path).
    xr, yr = jax.jit(reference_forward)(x, y, params)
    err = max(float(jnp.max(jnp.abs(xo - xr))), float(jnp.max(jnp.abs(yo - yr))))
    assert err < 0.1, f"mismatch vs reference: max abs err = {err}"

    print("KERNEL_OK")
</pallas_src>

<mosaic_0001>
module attributes {stable_mosaic.version = 11 : i64} {
  func.func @dwconv_stats_kernel(%arg0: i32, %arg1: i32, %arg2: i32, %arg3: memref<1x1x16x24x32xf32, #tpu.memory_space<vmem>>, %arg4: memref<1x1x8x24x32xf32, #tpu.memory_space<vmem>>, %arg5: memref<7x7x1x32xf32, #tpu.memory_space<vmem>>, %arg6: memref<1x32xf32, #tpu.memory_space<vmem>>, %arg7: memref<1x1x16x16x32xbf16, #tpu.memory_space<vmem>>, %arg8: memref<1x1x1x2x32xf32, #tpu.memory_space<vmem>>) attributes {dimension_semantics = [#tpu.dimension_semantics<parallel>, #tpu.dimension_semantics<parallel>, #tpu.dimension_semantics<parallel>], iteration_bounds = array<i64: 2, 2, 1>, scalar_prefetch = 0 : i64, scratch_operands = 0 : i64, tpu.core_type = #tpu.core_type<tc>, window_params = [{transform_indices = @transform_0, window_bounds = array<i64: 1, 1, 16, 24, 32>}, {transform_indices = @transform_1, window_bounds = array<i64: 1, 1, 8, 24, 32>}, {pipeline_mode = #tpu.pipeline_mode<synchronous>, transform_indices = @transform_2, window_bounds = array<i64: 7, 7, 1, 32>}, {pipeline_mode = #tpu.pipeline_mode<synchronous>, transform_indices = @transform_3, window_bounds = array<i64: 1, 32>}, {transform_indices = @transform_4, window_bounds = array<i64: 1, 1, 16, 16, 32>}, {transform_indices = @transform_5, window_bounds = array<i64: 1, 1, 1, 2, 32>}]} {
    %c0 = arith.constant 0 : index
    %c0_0 = arith.constant 0 : index
    %c0_1 = arith.constant 0 : index
    %c0_2 = arith.constant 0 : index
    %c0_3 = arith.constant 0 : index
    %0 = vector.load %arg4[%c0, %c0_0, %c0_1, %c0_2, %c0_3] : memref<1x1x8x24x32xf32, #tpu.memory_space<vmem>>, vector<1x1x8x24x32xf32>
    %1 = vector.shape_cast %0 : vector<1x1x8x24x32xf32> to vector<8x24x32xf32>
    %c0_4 = arith.constant 0 : index
    %c0_5 = arith.constant 0 : index
    %c0_6 = arith.constant 0 : index
    %c0_7 = arith.constant 0 : index
    %c0_8 = arith.constant 0 : index
    %2 = vector.load %arg3[%c0_4, %c0_5, %c0_6, %c0_7, %c0_8] : memref<1x1x16x24x32xf32, #tpu.memory_space<vmem>>, vector<1x1x16x24x32xf32>
    %3 = vector.shape_cast %2 : vector<1x1x16x24x32xf32> to vector<16x24x32xf32>
    %4 = vector.extract_strided_slice %1 {offsets = [0, 0, 0], sizes = [6, 24, 32], strides = [1, 1, 1]} : vector<8x24x32xf32> to vector<6x24x32xf32>
    %5 = tpu.concatenate %3, %4 in 0 : vector<16x24x32xf32>, vector<6x24x32xf32> -> vector<22x24x32xf32>
    %cst = arith.constant 0.000000e+00 : f32
    %6 = vector.broadcast %cst : f32 to vector<16x16x32xf32>
    %7 = vector.extract_strided_slice %5 {offsets = [0, 0, 0], sizes = [22, 16, 32], strides = [1, 1, 1]} : vector<22x24x32xf32> to vector<22x16x32xf32>
    %8 = vector.extract_strided_slice %7 {offsets = [0, 0, 0], sizes = [16, 16, 32], strides = [1, 1, 1]} : vector<22x16x32xf32> to vector<16x16x32xf32>
    %c0_9 = arith.constant 0 : index
    %c0_10 = arith.constant 0 : index
    %c0_11 = arith.constant 0 : index
    %c0_12 = arith.constant 0 : index
    %9 = vector.load %arg5[%c0_9, %c0_10, %c0_11, %c0_12] : memref<7x7x1x32xf32, #tpu.memory_space<vmem>>, vector<1x1x1x32xf32>
    %10 = vector.shape_cast %9 : vector<1x1x1x32xf32> to vector<1x32xf32>
    %11 = vector.shape_cast %10 : vector<1x32xf32> to vector<1x1x32xf32>
    %12 = vector.broadcast %11 : vector<1x1x32xf32> to vector<16x16x32xf32>
    %13 = arith.mulf %8, %12 : vector<16x16x32xf32>
    %14 = arith.addf %6, %13 : vector<16x16x32xf32>
    %15 = vector.extract_strided_slice %7 {offsets = [1, 0, 0], sizes = [16, 16, 32], strides = [1, 1, 1]} : vector<22x16x32xf32> to vector<16x16x32xf32>
    %c1 = arith.constant 1 : index
    %c0_13 = arith.constant 0 : index
    %c0_14 = arith.constant 0 : index
    %c0_15 = arith.constant 0 : index
    %16 = vector.load %arg5[%c1, %c0_13, %c0_14, %c0_15] : memref<7x7x1x32xf32, #tpu.memory_space<vmem>>, vector<1x1x1x32xf32>
    %17 = vector.shape_cast %16 : vector<1x1x1x32xf32> to vector<1x32xf32>
    %18 = vector.shape_cast %17 : vector<1x32xf32> to vector<1x1x32xf32>
    %19 = vector.broadcast %18 : vector<1x1x32xf32> to vector<16x16x32xf32>
    %20 = arith.mulf %15, %19 : vector<16x16x32xf32>
    %21 = arith.addf %14, %20 : vector<16x16x32xf32>
    %22 = vector.extract_strided_slice %7 {offsets = [2, 0, 0], sizes = [16, 16, 32], strides = [1, 1, 1]} : vector<22x16x32xf32> to vector<16x16x32xf32>
    %c2 = arith.constant 2 : index
    %c0_16 = arith.constant 0 : index
    %c0_17 = arith.constant 0 : index
    %c0_18 = arith.constant 0 : index
    %23 = vector.load %arg5[%c2, %c0_16, %c0_17, %c0_18] : memref<7x7x1x32xf32, #tpu.memory_space<vmem>>, vector<1x1x1x32xf32>
    %24 = vector.shape_cast %23 : vector<1x1x1x32xf32> to vector<1x32xf32>
    %25 = vector.shape_cast %24 : vector<1x32xf32> to vector<1x1x32xf32>
    %26 = vector.broadcast %25 : vector<1x1x32xf32> to vector<16x16x32xf32>
    %27 = arith.mulf %22, %26 : vector<16x16x32xf32>
    %28 = arith.addf %21, %27 : vector<16x16x32xf32>
    %29 = vector.extract_strided_slice %7 {offsets = [3, 0, 0], sizes = [16, 16, 32], strides = [1, 1, 1]} : vector<22x16x32xf32> to vector<16x16x32xf32>
    %c3 = arith.constant 3 : index
    %c0_19 = arith.constant 0 : index
    %c0_20 = arith.constant 0 : index
    %c0_21 = arith.constant 0 : index
    %30 = vector.load %arg5[%c3, %c0_19, %c0_20, %c0_21] : memref<7x7x1x32xf32, #tpu.memory_space<vmem>>, vector<1x1x1x32xf32>
    %31 = vector.shape_cast %30 : vector<1x1x1x32xf32> to vector<1x32xf32>
    %32 = vector.shape_cast %31 : vector<1x32xf32> to vector<1x1x32xf32>
    %33 = vector.broadcast %32 : vector<1x1x32xf32> to vector<16x16x32xf32>
    %34 = arith.mulf %29, %33 : vector<16x16x32xf32>
    %35 = arith.addf %28, %34 : vector<16x16x32xf32>
    %36 = vector.extract_strided_slice %7 {offsets = [4, 0, 0], sizes = [16, 16, 32], strides = [1, 1, 1]} : vector<22x16x32xf32> to vector<16x16x32xf32>
    %c4 = arith.constant 4 : index
    %c0_22 = arith.constant 0 : index
    %c0_23 = arith.constant 0 : index
    %c0_24 = arith.constant 0 : index
    %37 = vector.load %arg5[%c4, %c0_22, %c0_23, %c0_24] : memref<7x7x1x32xf32, #tpu.memory_space<vmem>>, vector<1x1x1x32xf32>
    %38 = vector.shape_cast %37 : vector<1x1x1x32xf32> to vector<1x32xf32>
    %39 = vector.shape_cast %38 : vector<1x32xf32> to vector<1x1x32xf32>
    %40 = vector.broadcast %39 : vector<1x1x32xf32> to vector<16x16x32xf32>
    %41 = arith.mulf %36, %40 : vector<16x16x32xf32>
    %42 = arith.addf %35, %41 : vector<16x16x32xf32>
    %43 = vector.extract_strided_slice %7 {offsets = [5, 0, 0], sizes = [16, 16, 32], strides = [1, 1, 1]} : vector<22x16x32xf32> to vector<16x16x32xf32>
    %c5 = arith.constant 5 : index
    %c0_25 = arith.constant 0 : index
    %c0_26 = arith.constant 0 : index
    %c0_27 = arith.constant 0 : index
    %44 = vector.load %arg5[%c5, %c0_25, %c0_26, %c0_27] : memref<7x7x1x32xf32, #tpu.memory_space<vmem>>, vector<1x1x1x32xf32>
    %45 = vector.shape_cast %44 : vector<1x1x1x32xf32> to vector<1x32xf32>
    %46 = vector.shape_cast %45 : vector<1x32xf32> to vector<1x1x32xf32>
    %47 = vector.broadcast %46 : vector<1x1x32xf32> to vector<16x16x32xf32>
    %48 = arith.mulf %43, %47 : vector<16x16x32xf32>
    %49 = arith.addf %42, %48 : vector<16x16x32xf32>
    %50 = vector.extract_strided_slice %7 {offsets = [6, 0, 0], sizes = [16, 16, 32], strides = [1, 1, 1]} : vector<22x16x32xf32> to vector<16x16x32xf32>
    %c6 = arith.constant 6 : index
    %c0_28 = arith.constant 0 : index
    %c0_29 = arith.constant 0 : index
    %c0_30 = arith.constant 0 : index
    %51 = vector.load %arg5[%c6, %c0_28, %c0_29, %c0_30] : memref<7x7x1x32xf32, #tpu.memory_space<vmem>>, vector<1x1x1x32xf32>
    %52 = vector.shape_cast %51 : vector<1x1x1x32xf32> to vector<1x32xf32>
    %53 = vector.shape_cast %52 : vector<1x32xf32> to vector<1x1x32xf32>
    %54 = vector.broadcast %53 : vector<1x1x32xf32> to vector<16x16x32xf32>
    %55 = arith.mulf %50, %54 : vector<16x16x32xf32>
    %56 = arith.addf %49, %55 : vector<16x16x32xf32>
    %c23_i32 = arith.constant 23 : i32
    %57 = tpu.dynamic_rotate %5 by %c23_i32 dim 1 : vector<22x24x32xf32>, i32 -> vector<22x24x32xf32>
    %58 = vector.extract_strided_slice %57 {offsets = [0, 0, 0], sizes = [22, 16, 32], strides = [1, 1, 1]} : vector<22x24x32xf32> to vector<22x16x32xf32>
    %59 = vector.extract_strided_slice %58 {offsets = [0, 0, 0], sizes = [16, 16, 32], strides = [1, 1, 1]} : vector<22x16x32xf32> to vector<16x16x32xf32>
    %c0_31 = arith.constant 0 : index
    %c1_32 = arith.constant 1 : index
    %c0_33 = arith.constant 0 : index
    %c0_34 = arith.constant 0 : index
    %60 = vector.load %arg5[%c0_31, %c1_32, %c0_33, %c0_34] : memref<7x7x1x32xf32, #tpu.memory_space<vmem>>, vector<1x1x1x32xf32>
    %61 = vector.shape_cast %60 : vector<1x1x1x32xf32> to vector<1x32xf32>
    %62 = vector.shape_cast %61 : vector<1x32xf32> to vector<1x1x32xf32>
    %63 = vector.broadcast %62 : vector<1x1x32xf32> to vector<16x16x32xf32>
    %64 = arith.mulf %59, %63 : vector<16x16x32xf32>
    %65 = arith.addf %56, %64 : vector<16x16x32xf32>
    %66 = vector.extract_strided_slice %58 {offsets = [1, 0, 0], sizes = [16, 16, 32], strides = [1, 1, 1]} : vector<22x16x32xf32> to vector<16x16x32xf32>
    %c1_35 = arith.constant 1 : index
    %c1_36 = arith.constant 1 : index
    %c0_37 = arith.constant 0 : index
    %c0_38 = arith.constant 0 : index
    %67 = vector.load %arg5[%c1_35, %c1_36, %c0_37, %c0_38] : memref<7x7x1x32xf32, #tpu.memory_space<vmem>>, vector<1x1x1x32xf32>
    %68 = vector.shape_cast %67 : vector<1x1x1x32xf32> to vector<1x32xf32>
    %69 = vector.shape_cast %68 : vector<1x32xf32> to vector<1x1x32xf32>
    %70 = vector.broadcast %69 : vector<1x1x32xf32> to vector<16x16x32xf32>
    %71 = arith.mulf %66, %70 : vector<16x16x32xf32>
    %72 = arith.addf %65, %71 : vector<16x16x32xf32>
    %73 = vector.extract_strided_slice %58 {offsets = [2, 0, 0], sizes = [16, 16, 32], strides = [1, 1, 1]} : vector<22x16x32xf32> to vector<16x16x32xf32>
    %c2_39 = arith.constant 2 : index
    %c1_40 = arith.constant 1 : index
    %c0_41 = arith.constant 0 : index
    %c0_42 = arith.constant 0 : index
    %74 = vector.load %arg5[%c2_39, %c1_40, %c0_41, %c0_42] : memref<7x7x1x32xf32, #tpu.memory_space<vmem>>, vector<1x1x1x32xf32>
    %75 = vector.shape_cast %74 : vector<1x1x1x32xf32> to vector<1x32xf32>
    %76 = vector.shape_cast %75 : vector<1x32xf32> to vector<1x1x32xf32>
    %77 = vector.broadcast %76 : vector<1x1x32xf32> to vector<16x16x32xf32>
    %78 = arith.mulf %73, %77 : vector<16x16x32xf32>
    %79 = arith.addf %72, %78 : vector<16x16x32xf32>
    %80 = vector.extract_strided_slice %58 {offsets = [3, 0, 0], sizes = [16, 16, 32], strides = [1, 1, 1]} : vector<22x16x32xf32> to vector<16x16x32xf32>
    %c3_43 = arith.constant 3 : index
    %c1_44 = arith.constant 1 : index
    %c0_45 = arith.constant 0 : index
    %c0_46 = arith.constant 0 : index
    %81 = vector.load %arg5[%c3_43, %c1_44, %c0_45, %c0_46] : memref<7x7x1x32xf32, #tpu.memory_space<vmem>>, vector<1x1x1x32xf32>
    %82 = vector.shape_cast %81 : vector<1x1x1x32xf32> to vector<1x32xf32>
    %83 = vector.shape_cast %82 : vector<1x32xf32> to vector<1x1x32xf32>
    %84 = vector.broadcast %83 : vector<1x1x32xf32> to vector<16x16x32xf32>
    %85 = arith.mulf %80, %84 : vector<16x16x32xf32>
    %86 = arith.addf %79, %85 : vector<16x16x32xf32>
    %87 = vector.extract_strided_slice %58 {offsets = [4, 0, 0], sizes = [16, 16, 32], strides = [1, 1, 1]} : vector<22x16x32xf32> to vector<16x16x32xf32>
    %c4_47 = arith.constant 4 : index
    %c1_48 = arith.constant 1 : index
    %c0_49 = arith.constant 0 : index
    %c0_50 = arith.constant 0 : index
    %88 = vector.load %arg5[%c4_47, %c1_48, %c0_49, %c0_50] : memref<7x7x1x32xf32, #tpu.memory_space<vmem>>, vector<1x1x1x32xf32>
    %89 = vector.shape_cast %88 : vector<1x1x1x32xf32> to vector<1x32xf32>
    %90 = vector.shape_cast %89 : vector<1x32xf32> to vector<1x1x32xf32>
    %91 = vector.broadcast %90 : vector<1x1x32xf32> to vector<16x16x32xf32>
    %92 = arith.mulf %87, %91 : vector<16x16x32xf32>
    %93 = arith.addf %86, %92 : vector<16x16x32xf32>
    %94 = vector.extract_strided_slice %58 {offsets = [5, 0, 0], sizes = [16, 16, 32], strides = [1, 1, 1]} : vector<22x16x32xf32> to vector<16x16x32xf32>
    %c5_51 = arith.constant 5 : index
    %c1_52 = arith.constant 1 : index
    %c0_53 = arith.constant 0 : index
    %c0_54 = arith.constant 0 : index
    %95 = vector.load %arg5[%c5_51, %c1_52, %c0_53, %c0_54] : memref<7x7x1x32xf32, #tpu.memory_space<vmem>>, vector<1x1x1x32xf32>
    %96 = vector.shape_cast %95 : vector<1x1x1x32xf32> to vector<1x32xf32>
    %97 = vector.shape_cast %96 : vector<1x32xf32> to vector<1x1x32xf32>
    %98 = vector.broadcast %97 : vector<1x1x32xf32> to vector<16x16x32xf32>
    %99 = arith.mulf %94, %98 : vector<16x16x32xf32>
    %100 = arith.addf %93, %99 : vector<16x16x32xf32>
    %101 = vector.extract_strided_slice %58 {offsets = [6, 0, 0], sizes = [16, 16, 32], strides = [1, 1, 1]} : vector<22x16x32xf32> to vector<16x16x32xf32>
    %c6_55 = arith.constant 6 : index
    %c1_56 = arith.constant 1 : index
    %c0_57 = arith.constant 0 : index
    %c0_58 = arith.constant 0 : index
    %102 = vector.load %arg5[%c6_55, %c1_56, %c0_57, %c0_58] : memref<7x7x1x32xf32, #tpu.memory_space<vmem>>, vector<1x1x1x32xf32>
    %103 = vector.shape_cast %102 : vector<1x1x1x32xf32> to vector<1x32xf32>
    %104 = vector.shape_cast %103 : vector<1x32xf32> to vector<1x1x32xf32>
    %105 = vector.broadcast %104 : vector<1x1x32xf32> to vector<16x16x32xf32>
    %106 = arith.mulf %101, %105 : vector<16x16x32xf32>
    %107 = arith.addf %100, %106 : vector<16x16x32xf32>
    %c22_i32 = arith.constant 22 : i32
    %108 = tpu.dynamic_rotate %5 by %c22_i32 dim 1 : vector<22x24x32xf32>, i32 -> vector<22x24x32xf32>
    %109 = vector.extract_strided_slice %108 {offsets = [0, 0, 0], sizes = [22, 16, 32], strides = [1, 1, 1]} : vector<22x24x32xf32> to vector<22x16x32xf32>
    %110 = vector.extract_strided_slice %109 {offsets = [0, 0, 0], sizes = [16, 16, 32], strides = [1, 1, 1]} : vector<22x16x32xf32> to vector<16x16x32xf32>
    %c0_59 = arith.constant 0 : index
    %c2_60 = arith.constant 2 : index
    %c0_61 = arith.constant 0 : index
    %c0_62 = arith.constant 0 : index
    %111 = vector.load %arg5[%c0_59, %c2_60, %c0_61, %c0_62] : memref<7x7x1x32xf32, #tpu.memory_space<vmem>>, vector<1x1x1x32xf32>
    %112 = vector.shape_cast %111 : vector<1x1x1x32xf32> to vector<1x32xf32>
    %113 = vector.shape_cast %112 : vector<1x32xf32> to vector<1x1x32xf32>
    %114 = vector.broadcast %113 : vector<1x1x32xf32> to vector<16x16x32xf32>
    %115 = arith.mulf %110, %114 : vector<16x16x32xf32>
    %116 = arith.addf %107, %115 : vector<16x16x32xf32>
    %117 = vector.extract_strided_slice %109 {offsets = [1, 0, 0], sizes = [16, 16, 32], strides = [1, 1, 1]} : vector<22x16x32xf32> to vector<16x16x32xf32>
    %c1_63 = arith.constant 1 : index
    %c2_64 = arith.constant 2 : index
    %c0_65 = arith.constant 0 : index
    %c0_66 = arith.constant 0 : index
    %118 = vector.load %arg5[%c1_63, %c2_64, %c0_65, %c0_66] : memref<7x7x1x32xf32, #tpu.memory_space<vmem>>, vector<1x1x1x32xf32>
    %119 = vector.shape_cast %118 : vector<1x1x1x32xf32> to vector<1x32xf32>
    %120 = vector.shape_cast %119 : vector<1x32xf32> to vector<1x1x32xf32>
    %121 = vector.broadcast %120 : vector<1x1x32xf32> to vector<16x16x32xf32>
    %122 = arith.mulf %117, %121 : vector<16x16x32xf32>
    %123 = arith.addf %116, %122 : vector<16x16x32xf32>
    %124 = vector.extract_strided_slice %109 {offsets = [2, 0, 0], sizes = [16, 16, 32], strides = [1, 1, 1]} : vector<22x16x32xf32> to vector<16x16x32xf32>
    %c2_67 = arith.constant 2 : index
    %c2_68 = arith.constant 2 : index
    %c0_69 = arith.constant 0 : index
    %c0_70 = arith.constant 0 : index
    %125 = vector.load %arg5[%c2_67, %c2_68, %c0_69, %c0_70] : memref<7x7x1x32xf32, #tpu.memory_space<vmem>>, vector<1x1x1x32xf32>
    %126 = vector.shape_cast %125 : vector<1x1x1x32xf32> to vector<1x32xf32>
    %127 = vector.shape_cast %126 : vector<1x32xf32> to vector<1x1x32xf32>
    %128 = vector.broadcast %127 : vector<1x1x32xf32> to vector<16x16x32xf32>
    %129 = arith.mulf %124, %128 : vector<16x16x32xf32>
    %130 = arith.addf %123, %129 : vector<16x16x32xf32>
    %131 = vector.extract_strided_slice %109 {offsets = [3, 0, 0], sizes = [16, 16, 32], strides = [1, 1, 1]} : vector<22x16x32xf32> to vector<16x16x32xf32>
    %c3_71 = arith.constant 3 : index
    %c2_72 = arith.constant 2 : index
    %c0_73 = arith.constant 0 : index
    %c0_74 = arith.constant 0 : index
    %132 = vector.load %arg5[%c3_71, %c2_72, %c0_73, %c0_74] : memref<7x7x1x32xf32, #tpu.memory_space<vmem>>, vector<1x1x1x32xf32>
    %133 = vector.shape_cast %132 : vector<1x1x1x32xf32> to vector<1x32xf32>
    %134 = vector.shape_cast %133 : vector<1x32xf32> to vector<1x1x32xf32>
    %135 = vector.broadcast %134 : vector<1x1x32xf32> to vector<16x16x32xf32>
    %136 = arith.mulf %131, %135 : vector<16x16x32xf32>
    %137 = arith.addf %130, %136 : vector<16x16x32xf32>
    %138 = vector.extract_strided_slice %109 {offsets = [4, 0, 0], sizes = [16, 16, 32], strides = [1, 1, 1]} : vector<22x16x32xf32> to vector<16x16x32xf32>
    %c4_75 = arith.constant 4 : index
    %c2_76 = arith.constant 2 : index
    %c0_77 = arith.constant 0 : index
    %c0_78 = arith.constant 0 : index
    %139 = vector.load %arg5[%c4_75, %c2_76, %c0_77, %c0_78] : memref<7x7x1x32xf32, #tpu.memory_space<vmem>>, vector<1x1x1x32xf32>
    %140 = vector.shape_cast %139 : vector<1x1x1x32xf32> to vector<1x32xf32>
    %141 = vector.shape_cast %140 : vector<1x32xf32> to vector<1x1x32xf32>
    %142 = vector.broadcast %141 : vector<1x1x32xf32> to vector<16x16x32xf32>
    %143 = arith.mulf %138, %142 : vector<16x16x32xf32>
    %144 = arith.addf %137, %143 : vector<16x16x32xf32>
    %145 = vector.extract_strided_slice %109 {offsets = [5, 0, 0], sizes = [16, 16, 32], strides = [1, 1, 1]} : vector<22x16x32xf32> to vector<16x16x32xf32>
    %c5_79 = arith.constant 5 : index
    %c2_80 = arith.constant 2 : index
    %c0_81 = arith.constant 0 : index
    %c0_82 = arith.constant 0 : index
    %146 = vector.load %arg5[%c5_79, %c2_80, %c0_81, %c0_82] : memref<7x7x1x32xf32, #tpu.memory_space<vmem>>, vector<1x1x1x32xf32>
    %147 = vector.shape_cast %146 : vector<1x1x1x32xf32> to vector<1x32xf32>
    %148 = vector.shape_cast %147 : vector<1x32xf32> to vector<1x1x32xf32>
    %149 = vector.broadcast %148 : vector<1x1x32xf32> to vector<16x16x32xf32>
    %150 = arith.mulf %145, %149 : vector<16x16x32xf32>
    %151 = arith.addf %144, %150 : vector<16x16x32xf32>
    %152 = vector.extract_strided_slice %109 {offsets = [6, 0, 0], sizes = [16, 16, 32], strides = [1, 1, 1]} : vector<22x16x32xf32> to vector<16x16x32xf32>
    %c6_83 = arith.constant 6 : index
    %c2_84 = arith.constant 2 : index
    %c0_85 = arith.constant 0 : index
    %c0_86 = arith.constant 0 : index
    %153 = vector.load %arg5[%c6_83, %c2_84, %c0_85, %c0_86] : memref<7x7x1x32xf32, #tpu.memory_space<vmem>>, vector<1x1x1x32xf32>
    %154 = vector.shape_cast %153 : vector<1x1x1x32xf32> to vector<1x32xf32>
    %155 = vector.shape_cast %154 : vector<1x32xf32> to vector<1x1x32xf32>
    %156 = vector.broadcast %155 : vector<1x1x32xf32> to vector<16x16x32xf32>
    %157 = arith.mulf %152, %156 : vector<16x16x32xf32>
    %158 = arith.addf %151, %157 : vector<16x16x32xf32>
    %c21_i32 = arith.constant 21 : i32
    %159 = tpu.dynamic_rotate %5 by %c21_i32 dim 1 : vector<22x24x32xf32>, i32 -> vector<22x24x32xf32>
    %160 = vector.extract_strided_slice %159 {offsets = [0, 0, 0], sizes = [22, 16, 32], strides = [1, 1, 1]} : vector<22x24x32xf32> to vector<22x16x32xf32>
    %161 = vector.extract_strided_slice %160 {offsets = [0, 0, 0], sizes = [16, 16, 32], strides = [1, 1, 1]} : vector<22x16x32xf32> to vector<16x16x32xf32>
    %c0_87 = arith.constant 0 : index
    %c3_88 = arith.constant 3 : index
    %c0_89 = arith.constant 0 : index
    %c0_90 = arith.constant 0 : index
    %162 = vector.load %arg5[%c0_87, %c3_88, %c0_89, %c0_90] : memref<7x7x1x32xf32, #tpu.memory_space<vmem>>, vector<1x1x1x32xf32>
    %163 = vector.shape_cast %162 : vector<1x1x1x32xf32> to vector<1x32xf32>
    %164 = vector.shape_cast %163 : vector<1x32xf32> to vector<1x1x32xf32>
    %165 = vector.broadcast %164 : vector<1x1x32xf32> to vector<16x16x32xf32>
    %166 = arith.mulf %161, %165 : vector<16x16x32xf32>
    %167 = arith.addf %158, %166 : vector<16x16x32xf32>
    %168 = vector.extract_strided_slice %160 {offsets = [1, 0, 0], sizes = [16, 16, 32], strides = [1, 1, 1]} : vector<22x16x32xf32> to vector<16x16x32xf32>
    %c1_91 = arith.constant 1 : index
    %c3_92 = arith.constant 3 : index
    %c0_93 = arith.constant 0 : index
    %c0_94 = arith.constant 0 : index
    %169 = vector.load %arg5[%c1_91, %c3_92, %c0_93, %c0_94] : memref<7x7x1x32xf32, #tpu.memory_space<vmem>>, vector<1x1x1x32xf32>
    %170 = vector.shape_cast %169 : vector<1x1x1x32xf32> to vector<1x32xf32>
    %171 = vector.shape_cast %170 : vector<1x32xf32> to vector<1x1x32xf32>
    %172 = vector.broadcast %171 : vector<1x1x32xf32> to vector<16x16x32xf32>
    %173 = arith.mulf %168, %172 : vector<16x16x32xf32>
    %174 = arith.addf %167, %173 : vector<16x16x32xf32>
    %175 = vector.extract_strided_slice %160 {offsets = [2, 0, 0], sizes = [16, 16, 32], strides = [1, 1, 1]} : vector<22x16x32xf32> to vector<16x16x32xf32>
    %c2_95 = arith.constant 2 : index
    %c3_96 = arith.constant 3 : index
    %c0_97 = arith.constant 0 : index
    %c0_98 = arith.constant 0 : index
    %176 = vector.load %arg5[%c2_95, %c3_96, %c0_97, %c0_98] : memref<7x7x1x32xf32, #tpu.memory_space<vmem>>, vector<1x1x1x32xf32>
    %177 = vector.shape_cast %176 : vector<1x1x1x32xf32> to vector<1x32xf32>
    %178 = vector.shape_cast %177 : vector<1x32xf32> to vector<1x1x32xf32>
    %179 = vector.broadcast %178 : vector<1x1x32xf32> to vector<16x16x32xf32>
    %180 = arith.mulf %175, %179 : vector<16x16x32xf32>
    %181 = arith.addf %174, %180 : vector<16x16x32xf32>
    %182 = vector.extract_strided_slice %160 {offsets = [3, 0, 0], sizes = [16, 16, 32], strides = [1, 1, 1]} : vector<22x16x32xf32> to vector<16x16x32xf32>
    %c3_99 = arith.constant 3 : index
    %c3_100 = arith.constant 3 : index
    %c0_101 = arith.constant 0 : index
    %c0_102 = arith.constant 0 : index
    %183 = vector.load %arg5[%c3_99, %c3_100, %c0_101, %c0_102] : memref<7x7x1x32xf32, #tpu.memory_space<vmem>>, vector<1x1x1x32xf32>
    %184 = vector.shape_cast %183 : vector<1x1x1x32xf32> to vector<1x32xf32>
    %185 = vector.shape_cast %184 : vector<1x32xf32> to vector<1x1x32xf32>
    %186 = vector.broadcast %185 : vector<1x1x32xf32> to vector<16x16x32xf32>
    %187 = arith.mulf %182, %186 : vector<16x16x32xf32>
    %188 = arith.addf %181, %187 : vector<16x16x32xf32>
    %189 = vector.extract_strided_slice %160 {offsets = [4, 0, 0], sizes = [16, 16, 32], strides = [1, 1, 1]} : vector<22x16x32xf32> to vector<16x16x32xf32>
    %c4_103 = arith.constant 4 : index
    %c3_104 = arith.constant 3 : index
    %c0_105 = arith.constant 0 : index
    %c0_106 = arith.constant 0 : index
    %190 = vector.load %arg5[%c4_103, %c3_104, %c0_105, %c0_106] : memref<7x7x1x32xf32, #tpu.memory_space<vmem>>, vector<1x1x1x32xf32>
    %191 = vector.shape_cast %190 : vector<1x1x1x32xf32> to vector<1x32xf32>
    %192 = vector.shape_cast %191 : vector<1x32xf32> to vector<1x1x32xf32>
    %193 = vector.broadcast %192 : vector<1x1x32xf32> to vector<16x16x32xf32>
    %194 = arith.mulf %189, %193 : vector<16x16x32xf32>
    %195 = arith.addf %188, %194 : vector<16x16x32xf32>
    %196 = vector.extract_strided_slice %160 {offsets = [5, 0, 0], sizes = [16, 16, 32], strides = [1, 1, 1]} : vector<22x16x32xf32> to vector<16x16x32xf32>
    %c5_107 = arith.constant 5 : index
    %c3_108 = arith.constant 3 : index
    %c0_109 = arith.constant 0 : index
    %c0_110 = arith.constant 0 : index
    %197 = vector.load %arg5[%c5_107, %c3_108, %c0_109, %c0_110] : memref<7x7x1x32xf32, #tpu.memory_space<vmem>>, vector<1x1x1x32xf32>
    %198 = vector.shape_cast %197 : vector<1x1x1x32xf32> to vector<1x32xf32>
    %199 = vector.shape_cast %198 : vector<1x32xf32> to vector<1x1x32xf32>
    %200 = vector.broadcast %199 : vector<1x1x32xf32> to vector<16x16x32xf32>
    %201 = arith.mulf %196, %200 : vector<16x16x32xf32>
    %202 = arith.addf %195, %201 : vector<16x16x32xf32>
    %203 = vector.extract_strided_slice %160 {offsets = [6, 0, 0], sizes = [16, 16, 32], strides = [1, 1, 1]} : vector<22x16x32xf32> to vector<16x16x32xf32>
    %c6_111 = arith.constant 6 : index
    %c3_112 = arith.constant 3 : index
    %c0_113 = arith.constant 0 : index
    %c0_114 = arith.constant 0 : index
    %204 = vector.load %arg5[%c6_111, %c3_112, %c0_113, %c0_114] : memref<7x7x1x32xf32, #tpu.memory_space<vmem>>, vector<1x1x1x32xf32>
    %205 = vector.shape_cast %204 : vector<1x1x1x32xf32> to vector<1x32xf32>
    %206 = vector.shape_cast %205 : vector<1x32xf32> to vector<1x1x32xf32>
    %207 = vector.broadcast %206 : vector<1x1x32xf32> to vector<16x16x32xf32>
    %208 = arith.mulf %203, %207 : vector<16x16x32xf32>
    %209 = arith.addf %202, %208 : vector<16x16x32xf32>
    %c20_i32 = arith.constant 20 : i32
    %210 = tpu.dynamic_rotate %5 by %c20_i32 dim 1 : vector<22x24x32xf32>, i32 -> vector<22x24x32xf32>
    %211 = vector.extract_strided_slice %210 {offsets = [0, 0, 0], sizes = [22, 16, 32], strides = [1, 1, 1]} : vector<22x24x32xf32> to vector<22x16x32xf32>
    %212 = vector.extract_strided_slice %211 {offsets = [0, 0, 0], sizes = [16, 16, 32], strides = [1, 1, 1]} : vector<22x16x32xf32> to vector<16x16x32xf32>
    %c0_115 = arith.constant 0 : index
    %c4_116 = arith.constant 4 : index
    %c0_117 = arith.constant 0 : index
    %c0_118 = arith.constant 0 : index
    %213 = vector.load %arg5[%c0_115, %c4_116, %c0_117, %c0_118] : memref<7x7x1x32xf32, #tpu.memory_space<vmem>>, vector<1x1x1x32xf32>
    %214 = vector.shape_cast %213 : vector<1x1x1x32xf32> to vector<1x32xf32>
    %215 = vector.shape_cast %214 : vector<1x32xf32> to vector<1x1x32xf32>
    %216 = vector.broadcast %215 : vector<1x1x32xf32> to vector<16x16x32xf32>
    %217 = arith.mulf %212, %216 : vector<16x16x32xf32>
    %218 = arith.addf %209, %217 : vector<16x16x32xf32>
    %219 = vector.extract_strided_slice %211 {offsets = [1, 0, 0], sizes = [16, 16, 32], strides = [1, 1, 1]} : vector<22x16x32xf32> to vector<16x16x32xf32>
    %c1_119 = arith.constant 1 : index
    %c4_120 = arith.constant 4 : index
    %c0_121 = arith.constant 0 : index
    %c0_122 = arith.constant 0 : index
    %220 = vector.load %arg5[%c1_119, %c4_120, %c0_121, %c0_122] : memref<7x7x1x32xf32, #tpu.memory_space<vmem>>, vector<1x1x1x32xf32>
    %221 = vector.shape_cast %220 : vector<1x1x1x32xf32> to vector<1x32xf32>
    %222 = vector.shape_cast %221 : vector<1x32xf32> to vector<1x1x32xf32>
    %223 = vector.broadcast %222 : vector<1x1x32xf32> to vector<16x16x32xf32>
    %224 = arith.mulf %219, %223 : vector<16x16x32xf32>
    %225 = arith.addf %218, %224 : vector<16x16x32xf32>
    %226 = vector.extract_strided_slice %211 {offsets = [2, 0, 0], sizes = [16, 16, 32], strides = [1, 1, 1]} : vector<22x16x32xf32> to vector<16x16x32xf32>
    %c2_123 = arith.constant 2 : index
    %c4_124 = arith.constant 4 : index
    %c0_125 = arith.constant 0 : index
    %c0_126 = arith.constant 0 : index
    %227 = vector.load %arg5[%c2_123, %c4_124, %c0_125, %c0_126] : memref<7x7x1x32xf32, #tpu.memory_space<vmem>>, vector<1x1x1x32xf32>
    %228 = vector.shape_cast %227 : vector<1x1x1x32xf32> to vector<1x32xf32>
    %229 = vector.shape_cast %228 : vector<1x32xf32> to vector<1x1x32xf32>
    %230 = vector.broadcast %229 : vector<1x1x32xf32> to vector<16x16x32xf32>
    %231 = arith.mulf %226, %230 : vector<16x16x32xf32>
    %232 = arith.addf %225, %231 : vector<16x16x32xf32>
    %233 = vector.extract_strided_slice %211 {offsets = [3, 0, 0], sizes = [16, 16, 32], strides = [1, 1, 1]} : vector<22x16x32xf32> to vector<16x16x32xf32>
    %c3_127 = arith.constant 3 : index
    %c4_128 = arith.constant 4 : index
    %c0_129 = arith.constant 0 : index
    %c0_130 = arith.constant 0 : index
    %234 = vector.load %arg5[%c3_127, %c4_128, %c0_129, %c0_130] : memref<7x7x1x32xf32, #tpu.memory_space<vmem>>, vector<1x1x1x32xf32>
    %235 = vector.shape_cast %234 : vector<1x1x1x32xf32> to vector<1x32xf32>
    %236 = vector.shape_cast %235 : vector<1x32xf32> to vector<1x1x32xf32>
    %237 = vector.broadcast %236 : vector<1x1x32xf32> to vector<16x16x32xf32>
    %238 = arith.mulf %233, %237 : vector<16x16x32xf32>
    %239 = arith.addf %232, %238 : vector<16x16x32xf32>
    %240 = vector.extract_strided_slice %211 {offsets = [4, 0, 0], sizes = [16, 16, 32], strides = [1, 1, 1]} : vector<22x16x32xf32> to vector<16x16x32xf32>
    %c4_131 = arith.constant 4 : index
    %c4_132 = arith.constant 4 : index
    %c0_133 = arith.constant 0 : index
    %c0_134 = arith.constant 0 : index
    %241 = vector.load %arg5[%c4_131, %c4_132, %c0_133, %c0_134] : memref<7x7x1x32xf32, #tpu.memory_space<vmem>>, vector<1x1x1x32xf32>
    %242 = vector.shape_cast %241 : vector<1x1x1x32xf32> to vector<1x32xf32>
    %243 = vector.shape_cast %242 : vector<1x32xf32> to vector<1x1x32xf32>
    %244 = vector.broadcast %243 : vector<1x1x32xf32> to vector<16x16x32xf32>
    %245 = arith.mulf %240, %244 : vector<16x16x32xf32>
    %246 = arith.addf %239, %245 : vector<16x16x32xf32>
    %247 = vector.extract_strided_slice %211 {offsets = [5, 0, 0], sizes = [16, 16, 32], strides = [1, 1, 1]} : vector<22x16x32xf32> to vector<16x16x32xf32>
    %c5_135 = arith.constant 5 : index
    %c4_136 = arith.constant 4 : index
    %c0_137 = arith.constant 0 : index
    %c0_138 = arith.constant 0 : index
    %248 = vector.load %arg5[%c5_135, %c4_136, %c0_137, %c0_138] : memref<7x7x1x32xf32, #tpu.memory_space<vmem>>, vector<1x1x1x32xf32>
    %249 = vector.shape_cast %248 : vector<1x1x1x32xf32> to vector<1x32xf32>
    %250 = vector.shape_cast %249 : vector<1x32xf32> to vector<1x1x32xf32>
    %251 = vector.broadcast %250 : vector<1x1x32xf32> to vector<16x16x32xf32>
    %252 = arith.mulf %247, %251 : vector<16x16x32xf32>
    %253 = arith.addf %246, %252 : vector<16x16x32xf32>
    %254 = vector.extract_strided_slice %211 {offsets = [6, 0, 0], sizes = [16, 16, 32], strides = [1, 1, 1]} : vector<22x16x32xf32> to vector<16x16x32xf32>
    %c6_139 = arith.constant 6 : index
    %c4_140 = arith.constant 4 : index
    %c0_141 = arith.constant 0 : index
    %c0_142 = arith.constant 0 : index
    %255 = vector.load %arg5[%c6_139, %c4_140, %c0_141, %c0_142] : memref<7x7x1x32xf32, #tpu.memory_space<vmem>>, vector<1x1x1x32xf32>
    %256 = vector.shape_cast %255 : vector<1x1x1x32xf32> to vector<1x32xf32>
    %257 = vector.shape_cast %256 : vector<1x32xf32> to vector<1x1x32xf32>
    %258 = vector.broadcast %257 : vector<1x1x32xf32> to vector<16x16x32xf32>
    %259 = arith.mulf %254, %258 : vector<16x16x32xf32>
    %260 = arith.addf %253, %259 : vector<16x16x32xf32>
    %c19_i32 = arith.constant 19 : i32
    %261 = tpu.dynamic_rotate %5 by %c19_i32 dim 1 : vector<22x24x32xf32>, i32 -> vector<22x24x32xf32>
    %262 = vector.extract_strided_slice %261 {offsets = [0, 0, 0], sizes = [22, 16, 32], strides = [1, 1, 1]} : vector<22x24x32xf32> to vector<22x16x32xf32>
    %263 = vector.extract_strided_slice %262 {offsets = [0, 0, 0], sizes = [16, 16, 32], strides = [1, 1, 1]} : vector<22x16x32xf32> to vector<16x16x32xf32>
    %c0_143 = arith.constant 0 : index
    %c5_144 = arith.constant 5 : index
    %c0_145 = arith.constant 0 : index
    %c0_146 = arith.constant 0 : index
    %264 = vector.load %arg5[%c0_143, %c5_144, %c0_145, %c0_146] : memref<7x7x1x32xf32, #tpu.memory_space<vmem>>, vector<1x1x1x32xf32>
    %265 = vector.shape_cast %264 : vector<1x1x1x32xf32> to vector<1x32xf32>
    %266 = vector.shape_cast %265 : vector<1x32xf32> to vector<1x1x32xf32>
    %267 = vector.broadcast %266 : vector<1x1x32xf32> to vector<16x16x32xf32>
    %268 = arith.mulf %263, %267 : vector<16x16x32xf32>
    %269 = arith.addf %260, %268 : vector<16x16x32xf32>
    %270 = vector.extract_strided_slice %262 {offsets = [1, 0, 0], sizes = [16, 16, 32], strides = [1, 1, 1]} : vector<22x16x32xf32> to vector<16x16x32xf32>
    %c1_147 = arith.constant 1 : index
    %c5_148 = arith.constant 5 : index
    %c0_149 = arith.constant 0 : index
    %c0_150 = arith.constant 0 : index
    %271 = vector.load %arg5[%c1_147, %c5_148, %c0_149, %c0_150] : memref<7x7x1x32xf32, #tpu.memory_space<vmem>>, vector<1x1x1x32xf32>
    %272 = vector.shape_cast %271 : vector<1x1x1x32xf32> to vector<1x32xf32>
    %273 = vector.shape_cast %272 : vector<1x32xf32> to vector<1x1x32xf32>
    %274 = vector.broadcast %273 : vector<1x1x32xf32> to vector<16x16x32xf32>
    %275 = arith.mulf %270, %274 : vector<16x16x32xf32>
    %276 = arith.addf %269, %275 : vector<16x16x32xf32>
    %277 = vector.extract_strided_slice %262 {offsets = [2, 0, 0], sizes = [16, 16, 32], strides = [1, 1, 1]} : vector<22x16x32xf32> to vector<16x16x32xf32>
    %c2_151 = arith.constant 2 : index
    %c5_152 = arith.constant 5 : index
    %c0_153 = arith.constant 0 : index
    %c0_154 = arith.constant 0 : index
    %278 = vector.load %arg5[%c2_151, %c5_152, %c0_153, %c0_154] : memref<7x7x1x32xf32, #tpu.memory_space<vmem>>, vector<1x1x1x32xf32>
    %279 = vector.shape_cast %278 : vector<1x1x1x32xf32> to vector<1x32xf32>
    %280 = vector.shape_cast %279 : vector<1x32xf32> to vector<1x1x32xf32>
    %281 = vector.broadcast %280 : vector<1x1x32xf32> to vector<16x16x32xf32>
    %282 = arith.mulf %277, %281 : vector<16x16x32xf32>
    %283 = arith.addf %276, %282 : vector<16x16x32xf32>
    %284 = vector.extract_strided_slice %262 {offsets = [3, 0, 0], sizes = [16, 16, 32], strides = [1, 1, 1]} : vector<22x16x32xf32> to vector<16x16x32xf32>
    %c3_155 = arith.constant 3 : index
    %c5_156 = arith.constant 5 : index
    %c0_157 = arith.constant 0 : index
    %c0_158 = arith.constant 0 : index
    %285 = vector.load %arg5[%c3_155, %c5_156, %c0_157, %c0_158] : memref<7x7x1x32xf32, #tpu.memory_space<vmem>>, vector<1x1x1x32xf32>
    %286 = vector.shape_cast %285 : vector<1x1x1x32xf32> to vector<1x32xf32>
    %287 = vector.shape_cast %286 : vector<1x32xf32> to vector<1x1x32xf32>
    %288 = vector.broadcast %287 : vector<1x1x32xf32> to vector<16x16x32xf32>
    %289 = arith.mulf %284, %288 : vector<16x16x32xf32>
    %290 = arith.addf %283, %289 : vector<16x16x32xf32>
    %291 = vector.extract_strided_slice %262 {offsets = [4, 0, 0], sizes = [16, 16, 32], strides = [1, 1, 1]} : vector<22x16x32xf32> to vector<16x16x32xf32>
    %c4_159 = arith.constant 4 : index
    %c5_160 = arith.constant 5 : index
    %c0_161 = arith.constant 0 : index
    %c0_162 = arith.constant 0 : index
    %292 = vector.load %arg5[%c4_159, %c5_160, %c0_161, %c0_162] : memref<7x7x1x32xf32, #tpu.memory_space<vmem>>, vector<1x1x1x32xf32>
    %293 = vector.shape_cast %292 : vector<1x1x1x32xf32> to vector<1x32xf32>
    %294 = vector.shape_cast %293 : vector<1x32xf32> to vector<1x1x32xf32>
    %295 = vector.broadcast %294 : vector<1x1x32xf32> to vector<16x16x32xf32>
    %296 = arith.mulf %291, %295 : vector<16x16x32xf32>
    %297 = arith.addf %290, %296 : vector<16x16x32xf32>
    %298 = vector.extract_strided_slice %262 {offsets = [5, 0, 0], sizes = [16, 16, 32], strides = [1, 1, 1]} : vector<22x16x32xf32> to vector<16x16x32xf32>
    %c5_163 = arith.constant 5 : index
    %c5_164 = arith.constant 5 : index
    %c0_165 = arith.constant 0 : index
    %c0_166 = arith.constant 0 : index
    %299 = vector.load %arg5[%c5_163, %c5_164, %c0_165, %c0_166] : memref<7x7x1x32xf32, #tpu.memory_space<vmem>>, vector<1x1x1x32xf32>
    %300 = vector.shape_cast %299 : vector<1x1x1x32xf32> to vector<1x32xf32>
    %301 = vector.shape_cast %300 : vector<1x32xf32> to vector<1x1x32xf32>
    %302 = vector.broadcast %301 : vector<1x1x32xf32> to vector<16x16x32xf32>
    %303 = arith.mulf %298, %302 : vector<16x16x32xf32>
    %304 = arith.addf %297, %303 : vector<16x16x32xf32>
    %305 = vector.extract_strided_slice %262 {offsets = [6, 0, 0], sizes = [16, 16, 32], strides = [1, 1, 1]} : vector<22x16x32xf32> to vector<16x16x32xf32>
    %c6_167 = arith.constant 6 : index
    %c5_168 = arith.constant 5 : index
    %c0_169 = arith.constant 0 : index
    %c0_170 = arith.constant 0 : index
    %306 = vector.load %arg5[%c6_167, %c5_168, %c0_169, %c0_170] : memref<7x7x1x32xf32, #tpu.memory_space<vmem>>, vector<1x1x1x32xf32>
    %307 = vector.shape_cast %306 : vector<1x1x1x32xf32> to vector<1x32xf32>
    %308 = vector.shape_cast %307 : vector<1x32xf32> to vector<1x1x32xf32>
    %309 = vector.broadcast %308 : vector<1x1x32xf32> to vector<16x16x32xf32>
    %310 = arith.mulf %305, %309 : vector<16x16x32xf32>
    %311 = arith.addf %304, %310 : vector<16x16x32xf32>
    %c18_i32 = arith.constant 18 : i32
    %312 = tpu.dynamic_rotate %5 by %c18_i32 dim 1 : vector<22x24x32xf32>, i32 -> vector<22x24x32xf32>
    %313 = vector.extract_strided_slice %312 {offsets = [0, 0, 0], sizes = [22, 16, 32], strides = [1, 1, 1]} : vector<22x24x32xf32> to vector<22x16x32xf32>
    %314 = vector.extract_strided_slice %313 {offsets = [0, 0, 0], sizes = [16, 16, 32], strides = [1, 1, 1]} : vector<22x16x32xf32> to vector<16x16x32xf32>
    %c0_171 = arith.constant 0 : index
    %c6_172 = arith.constant 6 : index
    %c0_173 = arith.constant 0 : index
    %c0_174 = arith.constant 0 : index
    %315 = vector.load %arg5[%c0_171, %c6_172, %c0_173, %c0_174] : memref<7x7x1x32xf32, #tpu.memory_space<vmem>>, vector<1x1x1x32xf32>
    %316 = vector.shape_cast %315 : vector<1x1x1x32xf32> to vector<1x32xf32>
    %317 = vector.shape_cast %316 : vector<1x32xf32> to vector<1x1x32xf32>
    %318 = vector.broadcast %317 : vector<1x1x32xf32> to vector<16x16x32xf32>
    %319 = arith.mulf %314, %318 : vector<16x16x32xf32>
    %320 = arith.addf %311, %319 : vector<16x16x32xf32>
    %321 = vector.extract_strided_slice %313 {offsets = [1, 0, 0], sizes = [16, 16, 32], strides = [1, 1, 1]} : vector<22x16x32xf32> to vector<16x16x32xf32>
    %c1_175 = arith.constant 1 : index
    %c6_176 = arith.constant 6 : index
    %c0_177 = arith.constant 0 : index
    %c0_178 = arith.constant 0 : index
    %322 = vector.load %arg5[%c1_175, %c6_176, %c0_177, %c0_178] : memref<7x7x1x32xf32, #tpu.memory_space<vmem>>, vector<1x1x1x32xf32>
    %323 = vector.shape_cast %322 : vector<1x1x1x32xf32> to vector<1x32xf32>
    %324 = vector.shape_cast %323 : vector<1x32xf32> to vector<1x1x32xf32>
    %325 = vector.broadcast %324 : vector<1x1x32xf32> to vector<16x16x32xf32>
    %326 = arith.mulf %321, %325 : vector<16x16x32xf32>
    %327 = arith.addf %320, %326 : vector<16x16x32xf32>
    %328 = vector.extract_strided_slice %313 {offsets = [2, 0, 0], sizes = [16, 16, 32], strides = [1, 1, 1]} : vector<22x16x32xf32> to vector<16x16x32xf32>
    %c2_179 = arith.constant 2 : index
    %c6_180 = arith.constant 6 : index
    %c0_181 = arith.constant 0 : index
    %c0_182 = arith.constant 0 : index
    %329 = vector.load %arg5[%c2_179, %c6_180, %c0_181, %c0_182] : memref<7x7x1x32xf32, #tpu.memory_space<vmem>>, vector<1x1x1x32xf32>
    %330 = vector.shape_cast %329 : vector<1x1x1x32xf32> to vector<1x32xf32>
    %331 = vector.shape_cast %330 : vector<1x32xf32> to vector<1x1x32xf32>
    %332 = vector.broadcast %331 : vector<1x1x32xf32> to vector<16x16x32xf32>
    %333 = arith.mulf %328, %332 : vector<16x16x32xf32>
    %334 = arith.addf %327, %333 : vector<16x16x32xf32>
    %335 = vector.extract_strided_slice %313 {offsets = [3, 0, 0], sizes = [16, 16, 32], strides = [1, 1, 1]} : vector<22x16x32xf32> to vector<16x16x32xf32>
    %c3_183 = arith.constant 3 : index
    %c6_184 = arith.constant 6 : index
    %c0_185 = arith.constant 0 : index
    %c0_186 = arith.constant 0 : index
    %336 = vector.load %arg5[%c3_183, %c6_184, %c0_185, %c0_186] : memref<7x7x1x32xf32, #tpu.memory_space<vmem>>, vector<1x1x1x32xf32>
    %337 = vector.shape_cast %336 : vector<1x1x1x32xf32> to vector<1x32xf32>
    %338 = vector.shape_cast %337 : vector<1x32xf32> to vector<1x1x32xf32>
    %339 = vector.broadcast %338 : vector<1x1x32xf32> to vector<16x16x32xf32>
    %340 = arith.mulf %335, %339 : vector<16x16x32xf32>
    %341 = arith.addf %334, %340 : vector<16x16x32xf32>
    %342 = vector.extract_strided_slice %313 {offsets = [4, 0, 0], sizes = [16, 16, 32], strides = [1, 1, 1]} : vector<22x16x32xf32> to vector<16x16x32xf32>
    %c4_187 = arith.constant 4 : index
    %c6_188 = arith.constant 6 : index
    %c0_189 = arith.constant 0 : index
    %c0_190 = arith.constant 0 : index
    %343 = vector.load %arg5[%c4_187, %c6_188, %c0_189, %c0_190] : memref<7x7x1x32xf32, #tpu.memory_space<vmem>>, vector<1x1x1x32xf32>
    %344 = vector.shape_cast %343 : vector<1x1x1x32xf32> to vector<1x32xf32>
    %345 = vector.shape_cast %344 : vector<1x32xf32> to vector<1x1x32xf32>
    %346 = vector.broadcast %345 : vector<1x1x32xf32> to vector<16x16x32xf32>
    %347 = arith.mulf %342, %346 : vector<16x16x32xf32>
    %348 = arith.addf %341, %347 : vector<16x16x32xf32>
    %349 = vector.extract_strided_slice %313 {offsets = [5, 0, 0], sizes = [16, 16, 32], strides = [1, 1, 1]} : vector<22x16x32xf32> to vector<16x16x32xf32>
    %c5_191 = arith.constant 5 : index
    %c6_192 = arith.constant 6 : index
    %c0_193 = arith.constant 0 : index
    %c0_194 = arith.constant 0 : index
    %350 = vector.load %arg5[%c5_191, %c6_192, %c0_193, %c0_194] : memref<7x7x1x32xf32, #tpu.memory_space<vmem>>, vector<1x1x1x32xf32>
    %351 = vector.shape_cast %350 : vector<1x1x1x32xf32> to vector<1x32xf32>
    %352 = vector.shape_cast %351 : vector<1x32xf32> to vector<1x1x32xf32>
    %353 = vector.broadcast %352 : vector<1x1x32xf32> to vector<16x16x32xf32>
    %354 = arith.mulf %349, %353 : vector<16x16x32xf32>
    %355 = arith.addf %348, %354 : vector<16x16x32xf32>
    %356 = vector.extract_strided_slice %313 {offsets = [6, 0, 0], sizes = [16, 16, 32], strides = [1, 1, 1]} : vector<22x16x32xf32> to vector<16x16x32xf32>
    %c6_195 = arith.constant 6 : index
    %c6_196 = arith.constant 6 : index
    %c0_197 = arith.constant 0 : index
    %c0_198 = arith.constant 0 : index
    %357 = vector.load %arg5[%c6_195, %c6_196, %c0_197, %c0_198] : memref<7x7x1x32xf32, #tpu.memory_space<vmem>>, vector<1x1x1x32xf32>
    %358 = vector.shape_cast %357 : vector<1x1x1x32xf32> to vector<1x32xf32>
    %359 = vector.shape_cast %358 : vector<1x32xf32> to vector<1x1x32xf32>
    %360 = vector.broadcast %359 : vector<1x1x32xf32> to vector<16x16x32xf32>
    %361 = arith.mulf %356, %360 : vector<16x16x32xf32>
    %362 = arith.addf %355, %361 : vector<16x16x32xf32>
    %c0_199 = arith.constant 0 : index
    %c0_200 = arith.constant 0 : index
    %363 = vector.load %arg6[%c0_199, %c0_200] : memref<1x32xf32, #tpu.memory_space<vmem>>, vector<1x32xf32>
    %364 = vector.shape_cast %363 : vector<1x32xf32> to vector<1x1x32xf32>
    %365 = vector.broadcast %364 : vector<1x1x32xf32> to vector<16x16x32xf32>
    %366 = arith.addf %362, %365 : vector<16x16x32xf32>
    %367 = arith.truncf %366 : vector<16x16x32xf32> to vector<16x16x32xbf16>
    %c0_201 = arith.constant 0 : index
    %c0_202 = arith.constant 0 : index
    %c0_203 = arith.constant 0 : index
    %c0_204 = arith.constant 0 : index
    %c0_205 = arith.constant 0 : index
    %368 = vector.load %arg7[%c0_201, %c0_202, %c0_203, %c0_204, %c0_205] : memref<1x1x16x16x32xbf16, #tpu.memory_space<vmem>>, vector<1x1x16x16x32xbf16>
    %369 = vector.shape_cast %368 : vector<1x1x16x16x32xbf16> to vector<16x16x32xbf16>
    %370 = vector.shape_cast %367 : vector<16x16x32xbf16> to vector<1x1x16x16x32xbf16>
    tpu.vector_store %arg7[%c0_201, %c0_202, %c0_203, %c0_204, %c0_205], %370 {strides = array<i32>} : memref<1x1x16x16x32xbf16, #tpu.memory_space<vmem>>, vector<1x1x16x16x32xbf16>,
    %cst_206 = arith.constant dense<0.000000e+00> : vector<16x32xf32>
    %371 = vector.multi_reduction <add>, %366, %cst_206 [0] : vector<16x16x32xf32> to vector<16x32xf32>
    %cst_207 = arith.constant dense<0.000000e+00> : vector<32xf32>
    %372 = vector.multi_reduction <add>, %371, %cst_207 [0] : vector<16x32xf32> to vector<32xf32>
    %373 = vector.shape_cast %372 : vector<32xf32> to vector<1x32xf32>
    %374 = arith.mulf %366, %366 : vector<16x16x32xf32>
    %cst_208 = arith.constant dense<0.000000e+00> : vector<16x32xf32>
    %375 = vector.multi_reduction <add>, %374, %cst_208 [0] : vector<16x16x32xf32> to vector<16x32xf32>
    %cst_209 = arith.constant dense<0.000000e+00> : vector<32xf32>
    %376 = vector.multi_reduction <add>, %375, %cst_209 [0] : vector<16x32xf32> to vector<32xf32>
    %377 = vector.shape_cast %376 : vector<32xf32> to vector<1x32xf32>
    %378 = tpu.concatenate %373, %377 in 0 : vector<1x32xf32>, vector<1x32xf32> -> vector<2x32xf32>
    %c0_210 = arith.constant 0 : index
    %c0_211 = arith.constant 0 : index
    %c0_212 = arith.constant 0 : index
    %c0_213 = arith.constant 0 : index
    %c0_214 = arith.constant 0 : index
    %379 = vector.load %arg8[%c0_210, %c0_211, %c0_212, %c0_213, %c0_214] : memref<1x1x1x2x32xf32, #tpu.memory_space<vmem>>, vector<1x1x1x2x32xf32>
    %380 = vector.shape_cast %379 : vector<1x1x1x2x32xf32> to vector<2x32xf32>
    %381 = vector.shape_cast %378 : vector<2x32xf32> to vector<1x1x1x2x32xf32>
    tpu.vector_store %arg8[%c0_210, %c0_211, %c0_212, %c0_213, %c0_214], %381 {strides = array<i32>} : memref<1x1x1x2x32xf32, #tpu.memory_space<vmem>>, vector<1x1x1x2x32xf32>,
    return
  }
  func.func @transform_0(%arg0: i32, %arg1: i32, %arg2: i32) -> (i32, i32, i32, i32, i32) {
    %c0_i32 = arith.constant 0 : i32
    %c0_i32_0 = arith.constant 0 : i32
    %c0_i32_1 = arith.constant 0 : i32
    return %arg0, %arg1, %arg2, %c0_i32, %c0_i32_0 : i32, i32, i32, i32, i32
  }
  func.func @transform_1(%arg0: i32, %arg1: i32, %arg2: i32) -> (i32, i32, i32, i32, i32) {
    %c1_i32 = arith.constant 1 : i32
    %0 = arith.addi %arg2, %c1_i32 : i32
    %c2_i32 = arith.constant 2 : i32
    %1 = arith.muli %0, %c2_i32 : i32
    %c0_i32 = arith.constant 0 : i32
    %c0_i32_0 = arith.constant 0 : i32
    %c0_i32_1 = arith.constant 0 : i32
    return %arg0, %arg1, %1, %c0_i32, %c0_i32_0 : i32, i32, i32, i32, i32
  }
  func.func @transform_2(%arg0: i32, %arg1: i32, %arg2: i32) -> (i32, i32, i32, i32) {
    %c0_i32 = arith.constant 0 : i32
    %c0_i32_0 = arith.constant 0 : i32
    %c0_i32_1 = arith.constant 0 : i32
    %c0_i32_2 = arith.constant 0 : i32
    %c0_i32_3 = arith.constant 0 : i32
    return %c0_i32, %c0_i32_0, %c0_i32_1, %c0_i32_2 : i32, i32, i32, i32
  }
  func.func @transform_3(%arg0: i32, %arg1: i32, %arg2: i32) -> (i32, i32) {
    %c0_i32 = arith.constant 0 : i32
    %c0_i32_0 = arith.constant 0 : i32
    %c0_i32_1 = arith.constant 0 : i32
    return %c0_i32, %c0_i32_0 : i32, i32
  }
  func.func @transform_4(%arg0: i32, %arg1: i32, %arg2: i32) -> (i32, i32, i32, i32, i32) {
    %c0_i32 = arith.constant 0 : i32
    %c0_i32_0 = arith.constant 0 : i32
    %c0_i32_1 = arith.constant 0 : i32
    return %arg0, %arg1, %arg2, %c0_i32, %c0_i32_0 : i32, i32, i32, i32, i32
  }
  func.func @transform_5(%arg0: i32, %arg1: i32, %arg2: i32) -> (i32, i32, i32, i32, i32) {
    %c0_i32 = arith.constant 0 : i32
    %c0_i32_0 = arith.constant 0 : i32
    %c0_i32_1 = arith.constant 0 : i32
    return %arg0, %arg1, %arg2, %c0_i32, %c0_i32_0 : i32, i32, i32, i32, i32
  }
}

module attributes {stable_mosaic.version = 11 : i64} {
  func.func @bn_pwconv1_gelu_kernel(%arg0: i32, %arg1: i32, %arg2: i32, %arg3: memref<1x1x256x32xbf16, #tpu.memory_space<vmem>>, %arg4: memref<1x1x32xf32, #tpu.memory_space<vmem>>, %arg5: memref<1x1x32xf32, #tpu.memory_space<vmem>>, %arg6: memref<32x128xbf16, #tpu.memory_space<vmem>>, %arg7: memref<1x128xf32, #tpu.memory_space<vmem>>, %arg8: memref<1x1x256x128xbf16, #tpu.memory_space<vmem>>, %arg9: memref<1x1x1x1x128xf32, #tpu.memory_space<vmem>>) attributes {dimension_semantics = [#tpu.dimension_semantics<parallel>, #tpu.dimension_semantics<parallel>, #tpu.dimension_semantics<parallel>], iteration_bounds = array<i64: 2, 2, 1>, scalar_prefetch = 0 : i64, scratch_operands = 0 : i64, tpu.core_type = #tpu.core_type<tc>, window_params = [{transform_indices = @transform_0, window_bounds = array<i64: 1, 1, 256, 32>}, {transform_indices = @transform_1, window_bounds = array<i64: 1, 1, 32>}, {transform_indices = @transform_2, window_bounds = array<i64: 1, 1, 32>}, {pipeline_mode = #tpu.pipeline_mode<synchronous>, transform_indices = @transform_3, window_bounds = array<i64: 32, 128>}, {pipeline_mode = #tpu.pipeline_mode<synchronous>, transform_indices = @transform_4, window_bounds = array<i64: 1, 128>}, {transform_indices = @transform_5, window_bounds = array<i64: 1, 1, 256, 128>}, {transform_indices = @transform_6, window_bounds = array<i64: 1, 1, 1, 1, 128>}]} {
    %c0 = arith.constant 0 : index
    %c0_0 = arith.constant 0 : index
    %c0_1 = arith.constant 0 : index
    %c0_2 = arith.constant 0 : index
    %0 = vector.load %arg3[%c0, %c0_0, %c0_1, %c0_2] : memref<1x1x256x32xbf16, #tpu.memory_space<vmem>>, vector<1x1x256x32xbf16>
    %1 = vector.shape_cast %0 : vector<1x1x256x32xbf16> to vector<256x32xbf16>
    %2 = arith.extf %1 : vector<256x32xbf16> to vector<256x32xf32>
    %c0_3 = arith.constant 0 : index
    %c0_4 = arith.constant 0 : index
    %c0_5 = arith.constant 0 : index
    %3 = vector.load %arg4[%c0_3, %c0_4, %c0_5] : memref<1x1x32xf32, #tpu.memory_space<vmem>>, vector<1x1x32xf32>
    %4 = vector.shape_cast %3 : vector<1x1x32xf32> to vector<1x32xf32>
    %5 = vector.broadcast %4 : vector<1x32xf32> to vector<256x32xf32>
    %6 = arith.mulf %2, %5 : vector<256x32xf32>
    %c0_6 = arith.constant 0 : index
    %c0_7 = arith.constant 0 : index
    %c0_8 = arith.constant 0 : index
    %7 = vector.load %arg5[%c0_6, %c0_7, %c0_8] : memref<1x1x32xf32, #tpu.memory_space<vmem>>, vector<1x1x32xf32>
    %8 = vector.shape_cast %7 : vector<1x1x32xf32> to vector<1x32xf32>
    %9 = vector.broadcast %8 : vector<1x32xf32> to vector<256x32xf32>
    %10 = arith.addf %6, %9 : vector<256x32xf32>
    %11 = arith.truncf %10 : vector<256x32xf32> to vector<256x32xbf16>
    %c0_9 = arith.constant 0 : index
    %c0_10 = arith.constant 0 : index
    %12 = vector.load %arg6[%c0_9, %c0_10] : memref<32x128xbf16, #tpu.memory_space<vmem>>, vector<32x128xbf16>
    %cst = arith.constant dense<0.000000e+00> : vector<256x128xf32>
    %13 = tpu.matmul %11, %12, %cst {dimension_numbers = #tpu.dot_dimension_numbers<[1], [0], [0], [1], [0, 0, 1, 1], [], []>} : vector<256x32xbf16>, vector<32x128xbf16>, vector<256x128xf32> -> vector<256x128xf32>
    %c0_11 = arith.constant 0 : index
    %c0_12 = arith.constant 0 : index
    %14 = vector.load %arg7[%c0_11, %c0_12] : memref<1x128xf32, #tpu.memory_space<vmem>>, vector<1x128xf32>
    %15 = vector.broadcast %14 : vector<1x128xf32> to vector<256x128xf32>
    %16 = arith.addf %13, %15 : vector<256x128xf32>
    %cst_13 = arith.constant 5.000000e-01 : f32
    %17 = vector.broadcast %cst_13 : f32 to vector<256x128xf32>
    %18 = arith.mulf %17, %16 : vector<256x128xf32>
    %cst_14 = arith.constant 0.707106769 : f32
    %19 = vector.broadcast %cst_14 : f32 to vector<256x128xf32>
    %20 = arith.mulf %16, %19 : vector<256x128xf32>
    %21 = math.absf %20 : vector<256x128xf32>
    %cst_15 = arith.constant 0.327591091 : f32
    %22 = vector.broadcast %cst_15 : f32 to vector<256x128xf32>
    %23 = arith.mulf %22, %21 : vector<256x128xf32>
    %cst_16 = arith.constant 1.000000e+00 : f32
    %24 = vector.broadcast %cst_16 : f32 to vector<256x128xf32>
    %25 = arith.addf %24, %23 : vector<256x128xf32>
    %cst_17 = arith.constant 1.000000e+00 : f32
    %26 = vector.broadcast %cst_17 : f32 to vector<256x128xf32>
    %27 = arith.divf %26, %25 : vector<256x128xf32>
    %cst_18 = arith.constant 1.06140542 : f32
    %28 = vector.broadcast %cst_18 : f32 to vector<256x128xf32>
    %29 = arith.mulf %28, %27 : vector<256x128xf32>
    %cst_19 = arith.constant -1.45315206 : f32
    %30 = vector.broadcast %cst_19 : f32 to vector<256x128xf32>
    %31 = arith.addf %29, %30 : vector<256x128xf32>
    %32 = arith.mulf %31, %27 : vector<256x128xf32>
    %cst_20 = arith.constant 1.42141378 : f32
    %33 = vector.broadcast %cst_20 : f32 to vector<256x128xf32>
    %34 = arith.addf %32, %33 : vector<256x128xf32>
    %35 = arith.mulf %34, %27 : vector<256x128xf32>
    %cst_21 = arith.constant -0.284496725 : f32
    %36 = vector.broadcast %cst_21 : f32 to vector<256x128xf32>
    %37 = arith.addf %35, %36 : vector<256x128xf32>
    %38 = arith.mulf %37, %27 : vector<256x128xf32>
    %cst_22 = arith.constant 0.254829586 : f32
    %39 = vector.broadcast %cst_22 : f32 to vector<256x128xf32>
    %40 = arith.addf %38, %39 : vector<256x128xf32>
    %41 = arith.mulf %40, %27 : vector<256x128xf32>
    %cst_23 = arith.constant 0.000000e+00 : f32
    %42 = vector.broadcast %cst_23 : f32 to vector<256x128xf32>
    %43 = arith.subf %42, %21 : vector<256x128xf32>
    %44 = arith.mulf %43, %21 : vector<256x128xf32>
    %45 = math.exp %44 : vector<256x128xf32>
    %46 = arith.mulf %41, %45 : vector<256x128xf32>
    %cst_24 = arith.constant 1.000000e+00 : f32
    %47 = vector.broadcast %cst_24 : f32 to vector<256x128xf32>
    %48 = arith.subf %47, %46 : vector<256x128xf32>
    %cst_25 = arith.constant 0.000000e+00 : f32
    %49 = vector.broadcast %cst_25 : f32 to vector<256x128xf32>
    %50 = arith.cmpf oge, %20, %49 : vector<256x128xf32>
    %cst_26 = arith.constant 0.000000e+00 : f32
    %51 = vector.broadcast %cst_26 : f32 to vector<256x128xf32>
    %52 = arith.subf %51, %48 : vector<256x128xf32>
    %53 = arith.select %50, %48, %52 : vector<256x128xi1>, vector<256x128xf32>
    %cst_27 = arith.constant 1.000000e+00 : f32
    %54 = vector.broadcast %cst_27 : f32 to vector<256x128xf32>
    %55 = arith.addf %54, %53 : vector<256x128xf32>
    %56 = arith.mulf %18, %55 : vector<256x128xf32>
    %57 = arith.truncf %56 : vector<256x128xf32> to vector<256x128xbf16>
    %c0_28 = arith.constant 0 : index
    %c0_29 = arith.constant 0 : index
    %c0_30 = arith.constant 0 : index
    %c0_31 = arith.constant 0 : index
    %58 = vector.load %arg8[%c0_28, %c0_29, %c0_30, %c0_31] : memref<1x1x256x128xbf16, #tpu.memory_space<vmem>>, vector<1x1x256x128xbf16>
    %59 = vector.shape_cast %58 : vector<1x1x256x128xbf16> to vector<256x128xbf16>
    %60 = vector.shape_cast %57 : vector<256x128xbf16> to vector<1x1x256x128xbf16>
    tpu.vector_store %arg8[%c0_28, %c0_29, %c0_30, %c0_31], %60 {strides = array<i32>} : memref<1x1x256x128xbf16, #tpu.memory_space<vmem>>, vector<1x1x256x128xbf16>,
    %61 = arith.mulf %56, %56 : vector<256x128xf32>
    %cst_32 = arith.constant dense<0.000000e+00> : vector<128xf32>
    %62 = vector.multi_reduction <add>, %61, %cst_32 [0] : vector<256x128xf32> to vector<128xf32>
    %63 = vector.shape_cast %62 : vector<128xf32> to vector<1x128xf32>
    %c0_33 = arith.constant 0 : index
    %c0_34 = arith.constant 0 : index
    %c0_35 = arith.constant 0 : index
    %c0_36 = arith.constant 0 : index
    %c0_37 = arith.constant 0 : index
    %64 = vector.load %arg9[%c0_33, %c0_34, %c0_35, %c0_36, %c0_37] : memref<1x1x1x1x128xf32, #tpu.memory_space<vmem>>, vector<1x1x1x1x128xf32>
    %65 = vector.shape_cast %64 : vector<1x1x1x1x128xf32> to vector<1x128xf32>
    %66 = vector.shape_cast %63 : vector<1x128xf32> to vector<1x1x1x1x128xf32>
    tpu.vector_store %arg9[%c0_33, %c0_34, %c0_35, %c0_36, %c0_37], %66 {strides = array<i32>} : memref<1x1x1x1x128xf32, #tpu.memory_space<vmem>>, vector<1x1x1x1x128xf32>,
    return
  }
  func.func @transform_0(%arg0: i32, %arg1: i32, %arg2: i32) -> (i32, i32, i32, i32) {
    %c0_i32 = arith.constant 0 : i32
    %c0_i32_0 = arith.constant 0 : i32
    return %arg0, %arg1, %arg2, %c0_i32 : i32, i32, i32, i32
  }
  func.func @transform_1(%arg0: i32, %arg1: i32, %arg2: i32) -> (i32, i32, i32) {
    %c0_i32 = arith.constant 0 : i32
    %c0_i32_0 = arith.constant 0 : i32
    %c0_i32_1 = arith.constant 0 : i32
    return %arg0, %c0_i32, %c0_i32_0 : i32, i32, i32
  }
  func.func @transform_2(%arg0: i32, %arg1: i32, %arg2: i32) -> (i32, i32, i32) {
    %c0_i32 = arith.constant 0 : i32
    %c0_i32_0 = arith.constant 0 : i32
    %c0_i32_1 = arith.constant 0 : i32
    return %arg0, %c0_i32, %c0_i32_0 : i32, i32, i32
  }
  func.func @transform_3(%arg0: i32, %arg1: i32, %arg2: i32) -> (i32, i32) {
    %c0_i32 = arith.constant 0 : i32
    %c0_i32_0 = arith.constant 0 : i32
    %c0_i32_1 = arith.constant 0 : i32
    return %c0_i32, %c0_i32_0 : i32, i32
  }
  func.func @transform_4(%arg0: i32, %arg1: i32, %arg2: i32) -> (i32, i32) {
    %c0_i32 = arith.constant 0 : i32
    %c0_i32_0 = arith.constant 0 : i32
    %c0_i32_1 = arith.constant 0 : i32
    return %c0_i32, %c0_i32_0 : i32, i32
  }
  func.func @transform_5(%arg0: i32, %arg1: i32, %arg2: i32) -> (i32, i32, i32, i32) {
    %c0_i32 = arith.constant 0 : i32
    %c0_i32_0 = arith.constant 0 : i32
    return %arg0, %arg1, %arg2, %c0_i32 : i32, i32, i32, i32
  }
  func.func @transform_6(%arg0: i32, %arg1: i32, %arg2: i32) -> (i32, i32, i32, i32, i32) {
    %c0_i32 = arith.constant 0 : i32
    %c0_i32_0 = arith.constant 0 : i32
    %c0_i32_1 = arith.constant 0 : i32
    return %arg0, %arg1, %arg2, %c0_i32, %c0_i32_0 : i32, i32, i32, i32, i32
  }
}

module attributes {stable_mosaic.version = 11 : i64} {
  func.func @grn_pwconv2_conv_kernel(%arg0: i32, %arg1: i32, %arg2: i32, %arg3: memref<1x1x256x128xbf16, #tpu.memory_space<vmem>>, %arg4: memref<1x1x256x32xf32, #tpu.memory_space<vmem>>, %arg5: memref<1x1x1x128xf32, #tpu.memory_space<vmem>>, %arg6: memref<1x128xf32, #tpu.memory_space<vmem>>, %arg7: memref<1x128xf32, #tpu.memory_space<vmem>>, %arg8: memref<128x32xbf16, #tpu.memory_space<vmem>>, %arg9: memref<1x32xf32, #tpu.memory_space<vmem>>, %arg10: memref<1x32x8xbf16, #tpu.memory_space<vmem>>, %arg11: memref<1x1x256x32xf32, #tpu.memory_space<vmem>>, %arg12: memref<1x1x256x8xf32, #tpu.memory_space<vmem>>) attributes {dimension_semantics = [#tpu.dimension_semantics<parallel>, #tpu.dimension_semantics<parallel>, #tpu.dimension_semantics<parallel>], iteration_bounds = array<i64: 2, 2, 1>, scalar_prefetch = 0 : i64, scratch_operands = 0 : i64, tpu.core_type = #tpu.core_type<tc>, window_params = [{transform_indices = @transform_0, window_bounds = array<i64: 1, 1, 256, 128>}, {transform_indices = @transform_1, window_bounds = array<i64: 1, 1, 256, 32>}, {transform_indices = @transform_2, window_bounds = array<i64: 1, 1, 1, 128>}, {pipeline_mode = #tpu.pipeline_mode<synchronous>, transform_indices = @transform_3, window_bounds = array<i64: 1, 128>}, {pipeline_mode = #tpu.pipeline_mode<synchronous>, transform_indices = @transform_4, window_bounds = array<i64: 1, 128>}, {pipeline_mode = #tpu.pipeline_mode<synchronous>, transform_indices = @transform_5, window_bounds = array<i64: 128, 32>}, {pipeline_mode = #tpu.pipeline_mode<synchronous>, transform_indices = @transform_6, window_bounds = array<i64: 1, 32>}, {transform_indices = @transform_7, window_bounds = array<i64: 1, 32, 8>}, {transform_indices = @transform_8, window_bounds = array<i64: 1, 1, 256, 32>}, {transform_indices = @transform_9, window_bounds = array<i64: 1, 1, 256, 8>}]} {
    %c0 = arith.constant 0 : index
    %c0_0 = arith.constant 0 : index
    %c0_1 = arith.constant 0 : index
    %c0_2 = arith.constant 0 : index
    %0 = vector.load %arg3[%c0, %c0_0, %c0_1, %c0_2] : memref<1x1x256x128xbf16, #tpu.memory_space<vmem>>, vector<1x1x256x128xbf16>
    %1 = vector.shape_cast %0 : vector<1x1x256x128xbf16> to vector<256x128xbf16>
    %2 = arith.extf %1 : vector<256x128xbf16> to vector<256x128xf32>
    %c0_3 = arith.constant 0 : index
    %c0_4 = arith.constant 0 : index
    %3 = vector.load %arg6[%c0_3, %c0_4] : memref<1x128xf32, #tpu.memory_space<vmem>>, vector<1x128xf32>
    %c0_5 = arith.constant 0 : index
    %c0_6 = arith.constant 0 : index
    %c0_7 = arith.constant 0 : index
    %c0_8 = arith.constant 0 : index
    %4 = vector.load %arg5[%c0_5, %c0_6, %c0_7, %c0_8] : memref<1x1x1x128xf32, #tpu.memory_space<vmem>>, vector<1x1x1x128xf32>
    %5 = vector.shape_cast %4 : vector<1x1x1x128xf32> to vector<1x128xf32>
    %6 = vector.broadcast %5 : vector<1x128xf32> to vector<256x128xf32>
    %7 = arith.mulf %2, %6 : vector<256x128xf32>
    %8 = vector.broadcast %3 : vector<1x128xf32> to vector<256x128xf32>
    %9 = arith.mulf %8, %7 : vector<256x128xf32>
    %c0_9 = arith.constant 0 : index
    %c0_10 = arith.constant 0 : index
    %10 = vector.load %arg7[%c0_9, %c0_10] : memref<1x128xf32, #tpu.memory_space<vmem>>, vector<1x128xf32>
    %11 = vector.broadcast %10 : vector<1x128xf32> to vector<256x128xf32>
    %12 = arith.addf %9, %11 : vector<256x128xf32>
    %13 = arith.addf %12, %2 : vector<256x128xf32>
    %14 = arith.truncf %13 : vector<256x128xf32> to vector<256x128xbf16>
    %c0_11 = arith.constant 0 : index
    %c0_12 = arith.constant 0 : index
    %15 = vector.load %arg8[%c0_11, %c0_12] : memref<128x32xbf16, #tpu.memory_space<vmem>>, vector<128x32xbf16>
    %cst = arith.constant dense<0.000000e+00> : vector<256x32xf32>
    %16 = tpu.matmul %14, %15, %cst {dimension_numbers = #tpu.dot_dimension_numbers<[1], [0], [0], [1], [0, 0, 1, 1], [], []>} : vector<256x128xbf16>, vector<128x32xbf16>, vector<256x32xf32> -> vector<256x32xf32>
    %c0_13 = arith.constant 0 : index
    %c0_14 = arith.constant 0 : index
    %17 = vector.load %arg9[%c0_13, %c0_14] : memref<1x32xf32, #tpu.memory_space<vmem>>, vector<1x32xf32>
    %18 = vector.broadcast %17 : vector<1x32xf32> to vector<256x32xf32>
    %19 = arith.addf %16, %18 : vector<256x32xf32>
    %c0_15 = arith.constant 0 : index
    %c0_16 = arith.constant 0 : index
    %c0_17 = arith.constant 0 : index
    %c0_18 = arith.constant 0 : index
    %20 = vector.load %arg4[%c0_15, %c0_16, %c0_17, %c0_18] : memref<1x1x256x32xf32, #tpu.memory_space<vmem>>, vector<1x1x256x32xf32>
    %21 = vector.shape_cast %20 : vector<1x1x256x32xf32> to vector<256x32xf32>
    %22 = arith.addf %21, %19 : vector<256x32xf32>
    %c0_19 = arith.constant 0 : index
    %c0_20 = arith.constant 0 : index
    %c0_21 = arith.constant 0 : index
    %c0_22 = arith.constant 0 : index
    %23 = vector.load %arg11[%c0_19, %c0_20, %c0_21, %c0_22] : memref<1x1x256x32xf32, #tpu.memory_space<vmem>>, vector<1x1x256x32xf32>
    %24 = vector.shape_cast %23 : vector<1x1x256x32xf32> to vector<256x32xf32>
    %25 = vector.shape_cast %22 : vector<256x32xf32> to vector<1x1x256x32xf32>
    tpu.vector_store %arg11[%c0_19, %c0_20, %c0_21, %c0_22], %25 {strides = array<i32>} : memref<1x1x256x32xf32, #tpu.memory_space<vmem>>, vector<1x1x256x32xf32>,
    %26 = arith.truncf %21 : vector<256x32xf32> to vector<256x32xbf16>
    %c0_23 = arith.constant 0 : index
    %c0_24 = arith.constant 0 : index
    %c0_25 = arith.constant 0 : index
    %27 = vector.load %arg10[%c0_23, %c0_24, %c0_25] : memref<1x32x8xbf16, #tpu.memory_space<vmem>>, vector<1x32x8xbf16>
    %28 = vector.shape_cast %27 : vector<1x32x8xbf16> to vector<32x8xbf16>
    %cst_26 = arith.constant dense<0.000000e+00> : vector<256x8xf32>
    %29 = tpu.matmul %26, %28, %cst_26 {dimension_numbers = #tpu.dot_dimension_numbers<[1], [0], [0], [1], [0, 0, 1, 1], [], []>} : vector<256x32xbf16>, vector<32x8xbf16>, vector<256x8xf32> -> vector<256x8xf32>
    %c0_27 = arith.constant 0 : index
    %c0_28 = arith.constant 0 : index
    %c0_29 = arith.constant 0 : index
    %c0_30 = arith.constant 0 : index
    %30 = vector.load %arg12[%c0_27, %c0_28, %c0_29, %c0_30] : memref<1x1x256x8xf32, #tpu.memory_space<vmem>>, vector<1x1x256x8xf32>
    %31 = vector.shape_cast %30 : vector<1x1x256x8xf32> to vector<256x8xf32>
    %32 = vector.shape_cast %29 : vector<256x8xf32> to vector<1x1x256x8xf32>
    tpu.vector_store %arg12[%c0_27, %c0_28, %c0_29, %c0_30], %32 {strides = array<i32>} : memref<1x1x256x8xf32, #tpu.memory_space<vmem>>, vector<1x1x256x8xf32>,
    return
  }
  func.func @transform_0(%arg0: i32, %arg1: i32, %arg2: i32) -> (i32, i32, i32, i32) {
    %c0_i32 = arith.constant 0 : i32
    %c0_i32_0 = arith.constant 0 : i32
    return %arg0, %arg1, %arg2, %c0_i32 : i32, i32, i32, i32
  }
  func.func @transform_1(%arg0: i32, %arg1: i32, %arg2: i32) -> (i32, i32, i32, i32) {
    %c0_i32 = arith.constant 0 : i32
    %c0_i32_0 = arith.constant 0 : i32
    return %arg0, %arg1, %arg2, %c0_i32 : i32, i32, i32, i32
  }
  func.func @transform_2(%arg0: i32, %arg1: i32, %arg2: i32) -> (i32, i32, i32, i32) {
    %c0_i32 = arith.constant 0 : i32
    %c0_i32_0 = arith.constant 0 : i32
    %c0_i32_1 = arith.constant 0 : i32
    return %arg0, %arg1, %c0_i32, %c0_i32_0 : i32, i32, i32, i32
  }
  func.func @transform_3(%arg0: i32, %arg1: i32, %arg2: i32) -> (i32, i32) {
    %c0_i32 = arith.constant 0 : i32
    %c0_i32_0 = arith.constant 0 : i32
    %c0_i32_1 = arith.constant 0 : i32
    return %c0_i32, %c0_i32_0 : i32, i32
  }
  func.func @transform_4(%arg0: i32, %arg1: i32, %arg2: i32) -> (i32, i32) {
    %c0_i32 = arith.constant 0 : i32
    %c0_i32_0 = arith.constant 0 : i32
    %c0_i32_1 = arith.constant 0 : i32
    return %c0_i32, %c0_i32_0 : i32, i32
  }
  func.func @transform_5(%arg0: i32, %arg1: i32, %arg2: i32) -> (i32, i32) {
    %c0_i32 = arith.constant 0 : i32
    %c0_i32_0 = arith.constant 0 : i32
    %c0_i32_1 = arith.constant 0 : i32
    return %c0_i32, %c0_i32_0 : i32, i32
  }
  func.func @transform_6(%arg0: i32, %arg1: i32, %arg2: i32) -> (i32, i32) {
    %c0_i32 = arith.constant 0 : i32
    %c0_i32_0 = arith.constant 0 : i32
    %c0_i32_1 = arith.constant 0 : i32
    return %c0_i32, %c0_i32_0 : i32, i32
  }
  func.func @transform_7(%arg0: i32, %arg1: i32, %arg2: i32) -> (i32, i32, i32) {
    %c0_i32 = arith.constant 0 : i32
    %c0_i32_0 = arith.constant 0 : i32
    %c0_i32_1 = arith.constant 0 : i32
    return %arg0, %c0_i32, %c0_i32_0 : i32, i32, i32
  }
  func.func @transform_8(%arg0: i32, %arg1: i32, %arg2: i32) -> (i32, i32, i32, i32) {
    %c0_i32 = arith.constant 0 : i32
    %c0_i32_0 = arith.constant 0 : i32
    return %arg0, %arg1, %arg2, %c0_i32 : i32, i32, i32, i32
  }
  func.func @transform_9(%arg0: i32, %arg1: i32, %arg2: i32) -> (i32, i32, i32, i32) {
    %c0_i32 = arith.constant 0 : i32
    %c0_i32_0 = arith.constant 0 : i32
    return %arg0, %arg1, %arg2, %c0_i32 : i32, i32, i32, i32
  }
}

module attributes {stable_mosaic.version = 11 : i64} {
  func.func @spatial_attn_kernel(%arg0: memref<2x14x2x14xf32, #tpu.memory_space<vmem>>, %arg1: memref<7x7x2x1xf32, #tpu.memory_space<vmem>>, %arg2: memref<2x8x8xf32, #tpu.memory_space<vmem>>) attributes {dimension_semantics = [], scalar_prefetch = 0 : i64, scratch_operands = 0 : i64, tpu.core_type = #tpu.core_type<tc>} {
    %c0 = arith.constant 0 : index
    %c0_0 = arith.constant 0 : index
    %c0_1 = arith.constant 0 : index
    %c0_2 = arith.constant 0 : index
    %0 = vector.load %arg0[%c0, %c0_0, %c0_1, %c0_2] : memref<2x14x2x14xf32, #tpu.memory_space<vmem>>, vector<2x14x2x14xf32>
    %cst = arith.constant 0.000000e+00 : f32
    %1 = vector.broadcast %cst : f32 to vector<2x8x2x8xf32>
    %2 = vector.extract_strided_slice %0 {offsets = [0, 0, 0, 0], sizes = [2, 14, 2, 8], strides = [1, 1, 1, 1]} : vector<2x14x2x14xf32> to vector<2x14x2x8xf32>
    %3 = vector.extract_strided_slice %2 {offsets = [0, 0, 0, 0], sizes = [2, 8, 2, 8], strides = [1, 1, 1, 1]} : vector<2x14x2x8xf32> to vector<2x8x2x8xf32>
    %c0_3 = arith.constant 0 : index
    %c0_4 = arith.constant 0 : index
    %c0_5 = arith.constant 0 : index
    %c0_6 = arith.constant 0 : index
    %4 = vector.load %arg1[%c0_3, %c0_4, %c0_5, %c0_6] : memref<7x7x2x1xf32, #tpu.memory_space<vmem>>, vector<1x1x2x1xf32>
    %5 = vector.shape_cast %4 : vector<1x1x2x1xf32> to vector<2x1xf32>
    %6 = vector.shape_cast %5 : vector<2x1xf32> to vector<1x1x2x1xf32>
    %7 = vector.broadcast %6 : vector<1x1x2x1xf32> to vector<2x8x2x8xf32>
    %8 = arith.mulf %3, %7 : vector<2x8x2x8xf32>
    %9 = arith.addf %1, %8 : vector<2x8x2x8xf32>
    %10 = vector.extract_strided_slice %2 {offsets = [0, 1, 0, 0], sizes = [2, 8, 2, 8], strides = [1, 1, 1, 1]} : vector<2x14x2x8xf32> to vector<2x8x2x8xf32>
    %c1 = arith.constant 1 : index
    %c0_7 = arith.constant 0 : index
    %c0_8 = arith.constant 0 : index
    %c0_9 = arith.constant 0 : index
    %11 = vector.load %arg1[%c1, %c0_7, %c0_8, %c0_9] : memref<7x7x2x1xf32, #tpu.memory_space<vmem>>, vector<1x1x2x1xf32>
    %12 = vector.shape_cast %11 : vector<1x1x2x1xf32> to vector<2x1xf32>
    %13 = vector.shape_cast %12 : vector<2x1xf32> to vector<1x1x2x1xf32>
    %14 = vector.broadcast %13 : vector<1x1x2x1xf32> to vector<2x8x2x8xf32>
    %15 = arith.mulf %10, %14 : vector<2x8x2x8xf32>
    %16 = arith.addf %9, %15 : vector<2x8x2x8xf32>
    %17 = vector.extract_strided_slice %2 {offsets = [0, 2, 0, 0], sizes = [2, 8, 2, 8], strides = [1, 1, 1, 1]} : vector<2x14x2x8xf32> to vector<2x8x2x8xf32>
    %c2 = arith.constant 2 : index
    %c0_10 = arith.constant 0 : index
    %c0_11 = arith.constant 0 : index
    %c0_12 = arith.constant 0 : index
    %18 = vector.load %arg1[%c2, %c0_10, %c0_11, %c0_12] : memref<7x7x2x1xf32, #tpu.memory_space<vmem>>, vector<1x1x2x1xf32>
    %19 = vector.shape_cast %18 : vector<1x1x2x1xf32> to vector<2x1xf32>
    %20 = vector.shape_cast %19 : vector<2x1xf32> to vector<1x1x2x1xf32>
    %21 = vector.broadcast %20 : vector<1x1x2x1xf32> to vector<2x8x2x8xf32>
    %22 = arith.mulf %17, %21 : vector<2x8x2x8xf32>
    %23 = arith.addf %16, %22 : vector<2x8x2x8xf32>
    %24 = vector.extract_strided_slice %2 {offsets = [0, 3, 0, 0], sizes = [2, 8, 2, 8], strides = [1, 1, 1, 1]} : vector<2x14x2x8xf32> to vector<2x8x2x8xf32>
    %c3 = arith.constant 3 : index
    %c0_13 = arith.constant 0 : index
    %c0_14 = arith.constant 0 : index
    %c0_15 = arith.constant 0 : index
    %25 = vector.load %arg1[%c3, %c0_13, %c0_14, %c0_15] : memref<7x7x2x1xf32, #tpu.memory_space<vmem>>, vector<1x1x2x1xf32>
    %26 = vector.shape_cast %25 : vector<1x1x2x1xf32> to vector<2x1xf32>
    %27 = vector.shape_cast %26 : vector<2x1xf32> to vector<1x1x2x1xf32>
    %28 = vector.broadcast %27 : vector<1x1x2x1xf32> to vector<2x8x2x8xf32>
    %29 = arith.mulf %24, %28 : vector<2x8x2x8xf32>
    %30 = arith.addf %23, %29 : vector<2x8x2x8xf32>
    %31 = vector.extract_strided_slice %2 {offsets = [0, 4, 0, 0], sizes = [2, 8, 2, 8], strides = [1, 1, 1, 1]} : vector<2x14x2x8xf32> to vector<2x8x2x8xf32>
    %c4 = arith.constant 4 : index
    %c0_16 = arith.constant 0 : index
    %c0_17 = arith.constant 0 : index
    %c0_18 = arith.constant 0 : index
    %32 = vector.load %arg1[%c4, %c0_16, %c0_17, %c0_18] : memref<7x7x2x1xf32, #tpu.memory_space<vmem>>, vector<1x1x2x1xf32>
    %33 = vector.shape_cast %32 : vector<1x1x2x1xf32> to vector<2x1xf32>
    %34 = vector.shape_cast %33 : vector<2x1xf32> to vector<1x1x2x1xf32>
    %35 = vector.broadcast %34 : vector<1x1x2x1xf32> to vector<2x8x2x8xf32>
    %36 = arith.mulf %31, %35 : vector<2x8x2x8xf32>
    %37 = arith.addf %30, %36 : vector<2x8x2x8xf32>
    %38 = vector.extract_strided_slice %2 {offsets = [0, 5, 0, 0], sizes = [2, 8, 2, 8], strides = [1, 1, 1, 1]} : vector<2x14x2x8xf32> to vector<2x8x2x8xf32>
    %c5 = arith.constant 5 : index
    %c0_19 = arith.constant 0 : index
    %c0_20 = arith.constant 0 : index
    %c0_21 = arith.constant 0 : index
    %39 = vector.load %arg1[%c5, %c0_19, %c0_20, %c0_21] : memref<7x7x2x1xf32, #tpu.memory_space<vmem>>, vector<1x1x2x1xf32>
    %40 = vector.shape_cast %39 : vector<1x1x2x1xf32> to vector<2x1xf32>
    %41 = vector.shape_cast %40 : vector<2x1xf32> to vector<1x1x2x1xf32>
    %42 = vector.broadcast %41 : vector<1x1x2x1xf32> to vector<2x8x2x8xf32>
    %43 = arith.mulf %38, %42 : vector<2x8x2x8xf32>
    %44 = arith.addf %37, %43 : vector<2x8x2x8xf32>
    %45 = vector.extract_strided_slice %2 {offsets = [0, 6, 0, 0], sizes = [2, 8, 2, 8], strides = [1, 1, 1, 1]} : vector<2x14x2x8xf32> to vector<2x8x2x8xf32>
    %c6 = arith.constant 6 : index
    %c0_22 = arith.constant 0 : index
    %c0_23 = arith.constant 0 : index
    %c0_24 = arith.constant 0 : index
    %46 = vector.load %arg1[%c6, %c0_22, %c0_23, %c0_24] : memref<7x7x2x1xf32, #tpu.memory_space<vmem>>, vector<1x1x2x1xf32>
    %47 = vector.shape_cast %46 : vector<1x1x2x1xf32> to vector<2x1xf32>
    %48 = vector.shape_cast %47 : vector<2x1xf32> to vector<1x1x2x1xf32>
    %49 = vector.broadcast %48 : vector<1x1x2x1xf32> to vector<2x8x2x8xf32>
    %50 = arith.mulf %45, %49 : vector<2x8x2x8xf32>
    %51 = arith.addf %44, %50 : vector<2x8x2x8xf32>
    %52 = vector.extract_strided_slice %0 {offsets = [0, 0, 0, 1], sizes = [2, 14, 2, 8], strides = [1, 1, 1, 1]} : vector<2x14x2x14xf32> to vector<2x14x2x8xf32>
    %53 = vector.extract_strided_slice %52 {offsets = [0, 0, 0, 0], sizes = [2, 8, 2, 8], strides = [1, 1, 1, 1]} : vector<2x14x2x8xf32> to vector<2x8x2x8xf32>
    %c0_25 = arith.constant 0 : index
    %c1_26 = arith.constant 1 : index
    %c0_27 = arith.constant 0 : index
    %c0_28 = arith.constant 0 : index
    %54 = vector.load %arg1[%c0_25, %c1_26, %c0_27, %c0_28] : memref<7x7x2x1xf32, #tpu.memory_space<vmem>>, vector<1x1x2x1xf32>
    %55 = vector.shape_cast %54 : vector<1x1x2x1xf32> to vector<2x1xf32>
    %56 = vector.shape_cast %55 : vector<2x1xf32> to vector<1x1x2x1xf32>
    %57 = vector.broadcast %56 : vector<1x1x2x1xf32> to vector<2x8x2x8xf32>
    %58 = arith.mulf %53, %57 : vector<2x8x2x8xf32>
    %59 = arith.addf %51, %58 : vector<2x8x2x8xf32>
    %60 = vector.extract_strided_slice %52 {offsets = [0, 1, 0, 0], sizes = [2, 8, 2, 8], strides = [1, 1, 1, 1]} : vector<2x14x2x8xf32> to vector<2x8x2x8xf32>
    %c1_29 = arith.constant 1 : index
    %c1_30 = arith.constant 1 : index
    %c0_31 = arith.constant 0 : index
    %c0_32 = arith.constant 0 : index
    %61 = vector.load %arg1[%c1_29, %c1_30, %c0_31, %c0_32] : memref<7x7x2x1xf32, #tpu.memory_space<vmem>>, vector<1x1x2x1xf32>
    %62 = vector.shape_cast %61 : vector<1x1x2x1xf32> to vector<2x1xf32>
    %63 = vector.shape_cast %62 : vector<2x1xf32> to vector<1x1x2x1xf32>
    %64 = vector.broadcast %63 : vector<1x1x2x1xf32> to vector<2x8x2x8xf32>
    %65 = arith.mulf %60, %64 : vector<2x8x2x8xf32>
    %66 = arith.addf %59, %65 : vector<2x8x2x8xf32>
    %67 = vector.extract_strided_slice %52 {offsets = [0, 2, 0, 0], sizes = [2, 8, 2, 8], strides = [1, 1, 1, 1]} : vector<2x14x2x8xf32> to vector<2x8x2x8xf32>
    %c2_33 = arith.constant 2 : index
    %c1_34 = arith.constant 1 : index
    %c0_35 = arith.constant 0 : index
    %c0_36 = arith.constant 0 : index
    %68 = vector.load %arg1[%c2_33, %c1_34, %c0_35, %c0_36] : memref<7x7x2x1xf32, #tpu.memory_space<vmem>>, vector<1x1x2x1xf32>
    %69 = vector.shape_cast %68 : vector<1x1x2x1xf32> to vector<2x1xf32>
    %70 = vector.shape_cast %69 : vector<2x1xf32> to vector<1x1x2x1xf32>
    %71 = vector.broadcast %70 : vector<1x1x2x1xf32> to vector<2x8x2x8xf32>
    %72 = arith.mulf %67, %71 : vector<2x8x2x8xf32>
    %73 = arith.addf %66, %72 : vector<2x8x2x8xf32>
    %74 = vector.extract_strided_slice %52 {offsets = [0, 3, 0, 0], sizes = [2, 8, 2, 8], strides = [1, 1, 1, 1]} : vector<2x14x2x8xf32> to vector<2x8x2x8xf32>
    %c3_37 = arith.constant 3 : index
    %c1_38 = arith.constant 1 : index
    %c0_39 = arith.constant 0 : index
    %c0_40 = arith.constant 0 : index
    %75 = vector.load %arg1[%c3_37, %c1_38, %c0_39, %c0_40] : memref<7x7x2x1xf32, #tpu.memory_space<vmem>>, vector<1x1x2x1xf32>
    %76 = vector.shape_cast %75 : vector<1x1x2x1xf32> to vector<2x1xf32>
    %77 = vector.shape_cast %76 : vector<2x1xf32> to vector<1x1x2x1xf32>
    %78 = vector.broadcast %77 : vector<1x1x2x1xf32> to vector<2x8x2x8xf32>
    %79 = arith.mulf %74, %78 : vector<2x8x2x8xf32>
    %80 = arith.addf %73, %79 : vector<2x8x2x8xf32>
    %81 = vector.extract_strided_slice %52 {offsets = [0, 4, 0, 0], sizes = [2, 8, 2, 8], strides = [1, 1, 1, 1]} : vector<2x14x2x8xf32> to vector<2x8x2x8xf32>
    %c4_41 = arith.constant 4 : index
    %c1_42 = arith.constant 1 : index
    %c0_43 = arith.constant 0 : index
    %c0_44 = arith.constant 0 : index
    %82 = vector.load %arg1[%c4_41, %c1_42, %c0_43, %c0_44] : memref<7x7x2x1xf32, #tpu.memory_space<vmem>>, vector<1x1x2x1xf32>
    %83 = vector.shape_cast %82 : vector<1x1x2x1xf32> to vector<2x1xf32>
    %84 = vector.shape_cast %83 : vector<2x1xf32> to vector<1x1x2x1xf32>
    %85 = vector.broadcast %84 : vector<1x1x2x1xf32> to vector<2x8x2x8xf32>
    %86 = arith.mulf %81, %85 : vector<2x8x2x8xf32>
    %87 = arith.addf %80, %86 : vector<2x8x2x8xf32>
    %88 = vector.extract_strided_slice %52 {offsets = [0, 5, 0, 0], sizes = [2, 8, 2, 8], strides = [1, 1, 1, 1]} : vector<2x14x2x8xf32> to vector<2x8x2x8xf32>
    %c5_45 = arith.constant 5 : index
    %c1_46 = arith.constant 1 : index
    %c0_47 = arith.constant 0 : index
    %c0_48 = arith.constant 0 : index
    %89 = vector.load %arg1[%c5_45, %c1_46, %c0_47, %c0_48] : memref<7x7x2x1xf32, #tpu.memory_space<vmem>>, vector<1x1x2x1xf32>
    %90 = vector.shape_cast %89 : vector<1x1x2x1xf32> to vector<2x1xf32>
    %91 = vector.shape_cast %90 : vector<2x1xf32> to vector<1x1x2x1xf32>
    %92 = vector.broadcast %91 : vector<1x1x2x1xf32> to vector<2x8x2x8xf32>
    %93 = arith.mulf %88, %92 : vector<2x8x2x8xf32>
    %94 = arith.addf %87, %93 : vector<2x8x2x8xf32>
    %95 = vector.extract_strided_slice %52 {offsets = [0, 6, 0, 0], sizes = [2, 8, 2, 8], strides = [1, 1, 1, 1]} : vector<2x14x2x8xf32> to vector<2x8x2x8xf32>
    %c6_49 = arith.constant 6 : index
    %c1_50 = arith.constant 1 : index
    %c0_51 = arith.constant 0 : index
    %c0_52 = arith.constant 0 : index
    %96 = vector.load %arg1[%c6_49, %c1_50, %c0_51, %c0_52] : memref<7x7x2x1xf32, #tpu.memory_space<vmem>>, vector<1x1x2x1xf32>
    %97 = vector.shape_cast %96 : vector<1x1x2x1xf32> to vector<2x1xf32>
    %98 = vector.shape_cast %97 : vector<2x1xf32> to vector<1x1x2x1xf32>
    %99 = vector.broadcast %98 : vector<1x1x2x1xf32> to vector<2x8x2x8xf32>
    %100 = arith.mulf %95, %99 : vector<2x8x2x8xf32>
    %101 = arith.addf %94, %100 : vector<2x8x2x8xf32>
    %102 = vector.extract_strided_slice %0 {offsets = [0, 0, 0, 2], sizes = [2, 14, 2, 8], strides = [1, 1, 1, 1]} : vector<2x14x2x14xf32> to vector<2x14x2x8xf32>
    %103 = vector.extract_strided_slice %102 {offsets = [0, 0, 0, 0], sizes = [2, 8, 2, 8], strides = [1, 1, 1, 1]} : vector<2x14x2x8xf32> to vector<2x8x2x8xf32>
    %c0_53 = arith.constant 0 : index
    %c2_54 = arith.constant 2 : index
    %c0_55 = arith.constant 0 : index
    %c0_56 = arith.constant 0 : index
    %104 = vector.load %arg1[%c0_53, %c2_54, %c0_55, %c0_56] : memref<7x7x2x1xf32, #tpu.memory_space<vmem>>, vector<1x1x2x1xf32>
    %105 = vector.shape_cast %104 : vector<1x1x2x1xf32> to vector<2x1xf32>
    %106 = vector.shape_cast %105 : vector<2x1xf32> to vector<1x1x2x1xf32>
    %107 = vector.broadcast %106 : vector<1x1x2x1xf32> to vector<2x8x2x8xf32>
    %108 = arith.mulf %103, %107 : vector<2x8x2x8xf32>
    %109 = arith.addf %101, %108 : vector<2x8x2x8xf32>
    %110 = vector.extract_strided_slice %102 {offsets = [0, 1, 0, 0], sizes = [2, 8, 2, 8], strides = [1, 1, 1, 1]} : vector<2x14x2x8xf32> to vector<2x8x2x8xf32>
    %c1_57 = arith.constant 1 : index
    %c2_58 = arith.constant 2 : index
    %c0_59 = arith.constant 0 : index
    %c0_60 = arith.constant 0 : index
    %111 = vector.load %arg1[%c1_57, %c2_58, %c0_59, %c0_60] : memref<7x7x2x1xf32, #tpu.memory_space<vmem>>, vector<1x1x2x1xf32>
    %112 = vector.shape_cast %111 : vector<1x1x2x1xf32> to vector<2x1xf32>
    %113 = vector.shape_cast %112 : vector<2x1xf32> to vector<1x1x2x1xf32>
    %114 = vector.broadcast %113 : vector<1x1x2x1xf32> to vector<2x8x2x8xf32>
    %115 = arith.mulf %110, %114 : vector<2x8x2x8xf32>
    %116 = arith.addf %109, %115 : vector<2x8x2x8xf32>
    %117 = vector.extract_strided_slice %102 {offsets = [0, 2, 0, 0], sizes = [2, 8, 2, 8], strides = [1, 1, 1, 1]} : vector<2x14x2x8xf32> to vector<2x8x2x8xf32>
    %c2_61 = arith.constant 2 : index
    %c2_62 = arith.constant 2 : index
    %c0_63 = arith.constant 0 : index
    %c0_64 = arith.constant 0 : index
    %118 = vector.load %arg1[%c2_61, %c2_62, %c0_63, %c0_64] : memref<7x7x2x1xf32, #tpu.memory_space<vmem>>, vector<1x1x2x1xf32>
    %119 = vector.shape_cast %118 : vector<1x1x2x1xf32> to vector<2x1xf32>
    %120 = vector.shape_cast %119 : vector<2x1xf32> to vector<1x1x2x1xf32>
    %121 = vector.broadcast %120 : vector<1x1x2x1xf32> to vector<2x8x2x8xf32>
    %122 = arith.mulf %117, %121 : vector<2x8x2x8xf32>
    %123 = arith.addf %116, %122 : vector<2x8x2x8xf32>
    %124 = vector.extract_strided_slice %102 {offsets = [0, 3, 0, 0], sizes = [2, 8, 2, 8], strides = [1, 1, 1, 1]} : vector<2x14x2x8xf32> to vector<2x8x2x8xf32>
    %c3_65 = arith.constant 3 : index
    %c2_66 = arith.constant 2 : index
    %c0_67 = arith.constant 0 : index
    %c0_68 = arith.constant 0 : index
    %125 = vector.load %arg1[%c3_65, %c2_66, %c0_67, %c0_68] : memref<7x7x2x1xf32, #tpu.memory_space<vmem>>, vector<1x1x2x1xf32>
    %126 = vector.shape_cast %125 : vector<1x1x2x1xf32> to vector<2x1xf32>
    %127 = vector.shape_cast %126 : vector<2x1xf32> to vector<1x1x2x1xf32>
    %128 = vector.broadcast %127 : vector<1x1x2x1xf32> to vector<2x8x2x8xf32>
    %129 = arith.mulf %124, %128 : vector<2x8x2x8xf32>
    %130 = arith.addf %123, %129 : vector<2x8x2x8xf32>
    %131 = vector.extract_strided_slice %102 {offsets = [0, 4, 0, 0], sizes = [2, 8, 2, 8], strides = [1, 1, 1, 1]} : vector<2x14x2x8xf32> to vector<2x8x2x8xf32>
    %c4_69 = arith.constant 4 : index
    %c2_70 = arith.constant 2 : index
    %c0_71 = arith.constant 0 : index
    %c0_72 = arith.constant 0 : index
    %132 = vector.load %arg1[%c4_69, %c2_70, %c0_71, %c0_72] : memref<7x7x2x1xf32, #tpu.memory_space<vmem>>, vector<1x1x2x1xf32>
    %133 = vector.shape_cast %132 : vector<1x1x2x1xf32> to vector<2x1xf32>
    %134 = vector.shape_cast %133 : vector<2x1xf32> to vector<1x1x2x1xf32>
    %135 = vector.broadcast %134 : vector<1x1x2x1xf32> to vector<2x8x2x8xf32>
    %136 = arith.mulf %131, %135 : vector<2x8x2x8xf32>
    %137 = arith.addf %130, %136 : vector<2x8x2x8xf32>
    %138 = vector.extract_strided_slice %102 {offsets = [0, 5, 0, 0], sizes = [2, 8, 2, 8], strides = [1, 1, 1, 1]} : vector<2x14x2x8xf32> to vector<2x8x2x8xf32>
    %c5_73 = arith.constant 5 : index
    %c2_74 = arith.constant 2 : index
    %c0_75 = arith.constant 0 : index
    %c0_76 = arith.constant 0 : index
    %139 = vector.load %arg1[%c5_73, %c2_74, %c0_75, %c0_76] : memref<7x7x2x1xf32, #tpu.memory_space<vmem>>, vector<1x1x2x1xf32>
    %140 = vector.shape_cast %139 : vector<1x1x2x1xf32> to vector<2x1xf32>
    %141 = vector.shape_cast %140 : vector<2x1xf32> to vector<1x1x2x1xf32>
    %142 = vector.broadcast %141 : vector<1x1x2x1xf32> to vector<2x8x2x8xf32>
    %143 = arith.mulf %138, %142 : vector<2x8x2x8xf32>
    %144 = arith.addf %137, %143 : vector<2x8x2x8xf32>
    %145 = vector.extract_strided_slice %102 {offsets = [0, 6, 0, 0], sizes = [2, 8, 2, 8], strides = [1, 1, 1, 1]} : vector<2x14x2x8xf32> to vector<2x8x2x8xf32>
    %c6_77 = arith.constant 6 : index
    %c2_78 = arith.constant 2 : index
    %c0_79 = arith.constant 0 : index
    %c0_80 = arith.constant 0 : index
    %146 = vector.load %arg1[%c6_77, %c2_78, %c0_79, %c0_80] : memref<7x7x2x1xf32, #tpu.memory_space<vmem>>, vector<1x1x2x1xf32>
    %147 = vector.shape_cast %146 : vector<1x1x2x1xf32> to vector<2x1xf32>
    %148 = vector.shape_cast %147 : vector<2x1xf32> to vector<1x1x2x1xf32>
    %149 = vector.broadcast %148 : vector<1x1x2x1xf32> to vector<2x8x2x8xf32>
    %150 = arith.mulf %145, %149 : vector<2x8x2x8xf32>
    %151 = arith.addf %144, %150 : vector<2x8x2x8xf32>
    %152 = vector.extract_strided_slice %0 {offsets = [0, 0, 0, 3], sizes = [2, 14, 2, 8], strides = [1, 1, 1, 1]} : vector<2x14x2x14xf32> to vector<2x14x2x8xf32>
    %153 = vector.extract_strided_slice %152 {offsets = [0, 0, 0, 0], sizes = [2, 8, 2, 8], strides = [1, 1, 1, 1]} : vector<2x14x2x8xf32> to vector<2x8x2x8xf32>
    %c0_81 = arith.constant 0 : index
    %c3_82 = arith.constant 3 : index
    %c0_83 = arith.constant 0 : index
    %c0_84 = arith.constant 0 : index
    %154 = vector.load %arg1[%c0_81, %c3_82, %c0_83, %c0_84] : memref<7x7x2x1xf32, #tpu.memory_space<vmem>>, vector<1x1x2x1xf32>
    %155 = vector.shape_cast %154 : vector<1x1x2x1xf32> to vector<2x1xf32>
    %156 = vector.shape_cast %155 : vector<2x1xf32> to vector<1x1x2x1xf32>
    %157 = vector.broadcast %156 : vector<1x1x2x1xf32> to vector<2x8x2x8xf32>
    %158 = arith.mulf %153, %157 : vector<2x8x2x8xf32>
    %159 = arith.addf %151, %158 : vector<2x8x2x8xf32>
    %160 = vector.extract_strided_slice %152 {offsets = [0, 1, 0, 0], sizes = [2, 8, 2, 8], strides = [1, 1, 1, 1]} : vector<2x14x2x8xf32> to vector<2x8x2x8xf32>
    %c1_85 = arith.constant 1 : index
    %c3_86 = arith.constant 3 : index
    %c0_87 = arith.constant 0 : index
    %c0_88 = arith.constant 0 : index
    %161 = vector.load %arg1[%c1_85, %c3_86, %c0_87, %c0_88] : memref<7x7x2x1xf32, #tpu.memory_space<vmem>>, vector<1x1x2x1xf32>
    %162 = vector.shape_cast %161 : vector<1x1x2x1xf32> to vector<2x1xf32>
    %163 = vector.shape_cast %162 : vector<2x1xf32> to vector<1x1x2x1xf32>
    %164 = vector.broadcast %163 : vector<1x1x2x1xf32> to vector<2x8x2x8xf32>
    %165 = arith.mulf %160, %164 : vector<2x8x2x8xf32>
    %166 = arith.addf %159, %165 : vector<2x8x2x8xf32>
    %167 = vector.extract_strided_slice %152 {offsets = [0, 2, 0, 0], sizes = [2, 8, 2, 8], strides = [1, 1, 1, 1]} : vector<2x14x2x8xf32> to vector<2x8x2x8xf32>
    %c2_89 = arith.constant 2 : index
    %c3_90 = arith.constant 3 : index
    %c0_91 = arith.constant 0 : index
    %c0_92 = arith.constant 0 : index
    %168 = vector.load %arg1[%c2_89, %c3_90, %c0_91, %c0_92] : memref<7x7x2x1xf32, #tpu.memory_space<vmem>>, vector<1x1x2x1xf32>
    %169 = vector.shape_cast %168 : vector<1x1x2x1xf32> to vector<2x1xf32>
    %170 = vector.shape_cast %169 : vector<2x1xf32> to vector<1x1x2x1xf32>
    %171 = vector.broadcast %170 : vector<1x1x2x1xf32> to vector<2x8x2x8xf32>
    %172 = arith.mulf %167, %171 : vector<2x8x2x8xf32>
    %173 = arith.addf %166, %172 : vector<2x8x2x8xf32>
    %174 = vector.extract_strided_slice %152 {offsets = [0, 3, 0, 0], sizes = [2, 8, 2, 8], strides = [1, 1, 1, 1]} : vector<2x14x2x8xf32> to vector<2x8x2x8xf32>
    %c3_93 = arith.constant 3 : index
    %c3_94 = arith.constant 3 : index
    %c0_95 = arith.constant 0 : index
    %c0_96 = arith.constant 0 : index
    %175 = vector.load %arg1[%c3_93, %c3_94, %c0_95, %c0_96] : memref<7x7x2x1xf32, #tpu.memory_space<vmem>>, vector<1x1x2x1xf32>
    %176 = vector.shape_cast %175 : vector<1x1x2x1xf32> to vector<2x1xf32>
    %177 = vector.shape_cast %176 : vector<2x1xf32> to vector<1x1x2x1xf32>
    %178 = vector.broadcast %177 : vector<1x1x2x1xf32> to vector<2x8x2x8xf32>
    %179 = arith.mulf %174, %178 : vector<2x8x2x8xf32>
    %180 = arith.addf %173, %179 : vector<2x8x2x8xf32>
    %181 = vector.extract_strided_slice %152 {offsets = [0, 4, 0, 0], sizes = [2, 8, 2, 8], strides = [1, 1, 1, 1]} : vector<2x14x2x8xf32> to vector<2x8x2x8xf32>
    %c4_97 = arith.constant 4 : index
    %c3_98 = arith.constant 3 : index
    %c0_99 = arith.constant 0 : index
    %c0_100 = arith.constant 0 : index
    %182 = vector.load %arg1[%c4_97, %c3_98, %c0_99, %c0_100] : memref<7x7x2x1xf32, #tpu.memory_space<vmem>>, vector<1x1x2x1xf32>
    %183 = vector.shape_cast %182 : vector<1x1x2x1xf32> to vector<2x1xf32>
    %184 = vector.shape_cast %183 : vector<2x1xf32> to vector<1x1x2x1xf32>
    %185 = vector.broadcast %184 : vector<1x1x2x1xf32> to vector<2x8x2x8xf32>
    %186 = arith.mulf %181, %185 : vector<2x8x2x8xf32>
    %187 = arith.addf %180, %186 : vector<2x8x2x8xf32>
    %188 = vector.extract_strided_slice %152 {offsets = [0, 5, 0, 0], sizes = [2, 8, 2, 8], strides = [1, 1, 1, 1]} : vector<2x14x2x8xf32> to vector<2x8x2x8xf32>
    %c5_101 = arith.constant 5 : index
    %c3_102 = arith.constant 3 : index
    %c0_103 = arith.constant 0 : index
    %c0_104 = arith.constant 0 : index
    %189 = vector.load %arg1[%c5_101, %c3_102, %c0_103, %c0_104] : memref<7x7x2x1xf32, #tpu.memory_space<vmem>>, vector<1x1x2x1xf32>
    %190 = vector.shape_cast %189 : vector<1x1x2x1xf32> to vector<2x1xf32>
    %191 = vector.shape_cast %190 : vector<2x1xf32> to vector<1x1x2x1xf32>
    %192 = vector.broadcast %191 : vector<1x1x2x1xf32> to vector<2x8x2x8xf32>
    %193 = arith.mulf %188, %192 : vector<2x8x2x8xf32>
    %194 = arith.addf %187, %193 : vector<2x8x2x8xf32>
    %195 = vector.extract_strided_slice %152 {offsets = [0, 6, 0, 0], sizes = [2, 8, 2, 8], strides = [1, 1, 1, 1]} : vector<2x14x2x8xf32> to vector<2x8x2x8xf32>
    %c6_105 = arith.constant 6 : index
    %c3_106 = arith.constant 3 : index
    %c0_107 = arith.constant 0 : index
    %c0_108 = arith.constant 0 : index
    %196 = vector.load %arg1[%c6_105, %c3_106, %c0_107, %c0_108] : memref<7x7x2x1xf32, #tpu.memory_space<vmem>>, vector<1x1x2x1xf32>
    %197 = vector.shape_cast %196 : vector<1x1x2x1xf32> to vector<2x1xf32>
    %198 = vector.shape_cast %197 : vector<2x1xf32> to vector<1x1x2x1xf32>
    %199 = vector.broadcast %198 : vector<1x1x2x1xf32> to vector<2x8x2x8xf32>
    %200 = arith.mulf %195, %199 : vector<2x8x2x8xf32>
    %201 = arith.addf %194, %200 : vector<2x8x2x8xf32>
    %202 = vector.extract_strided_slice %0 {offsets = [0, 0, 0, 4], sizes = [2, 14, 2, 8], strides = [1, 1, 1, 1]} : vector<2x14x2x14xf32> to vector<2x14x2x8xf32>
    %203 = vector.extract_strided_slice %202 {offsets = [0, 0, 0, 0], sizes = [2, 8, 2, 8], strides = [1, 1, 1, 1]} : vector<2x14x2x8xf32> to vector<2x8x2x8xf32>
    %c0_109 = arith.constant 0 : index
    %c4_110 = arith.constant 4 : index
    %c0_111 = arith.constant 0 : index
    %c0_112 = arith.constant 0 : index
    %204 = vector.load %arg1[%c0_109, %c4_110, %c0_111, %c0_112] : memref<7x7x2x1xf32, #tpu.memory_space<vmem>>, vector<1x1x2x1xf32>
    %205 = vector.shape_cast %204 : vector<1x1x2x1xf32> to vector<2x1xf32>
    %206 = vector.shape_cast %205 : vector<2x1xf32> to vector<1x1x2x1xf32>
    %207 = vector.broadcast %206 : vector<1x1x2x1xf32> to vector<2x8x2x8xf32>
    %208 = arith.mulf %203, %207 : vector<2x8x2x8xf32>
    %209 = arith.addf %201, %208 : vector<2x8x2x8xf32>
    %210 = vector.extract_strided_slice %202 {offsets = [0, 1, 0, 0], sizes = [2, 8, 2, 8], strides = [1, 1, 1, 1]} : vector<2x14x2x8xf32> to vector<2x8x2x8xf32>
    %c1_113 = arith.constant 1 : index
    %c4_114 = arith.constant 4 : index
    %c0_115 = arith.constant 0 : index
    %c0_116 = arith.constant 0 : index
    %211 = vector.load %arg1[%c1_113, %c4_114, %c0_115, %c0_116] : memref<7x7x2x1xf32, #tpu.memory_space<vmem>>, vector<1x1x2x1xf32>
    %212 = vector.shape_cast %211 : vector<1x1x2x1xf32> to vector<2x1xf32>
    %213 = vector.shape_cast %212 : vector<2x1xf32> to vector<1x1x2x1xf32>
    %214 = vector.broadcast %213 : vector<1x1x2x1xf32> to vector<2x8x2x8xf32>
    %215 = arith.mulf %210, %214 : vector<2x8x2x8xf32>
    %216 = arith.addf %209, %215 : vector<2x8x2x8xf32>
    %217 = vector.extract_strided_slice %202 {offsets = [0, 2, 0, 0], sizes = [2, 8, 2, 8], strides = [1, 1, 1, 1]} : vector<2x14x2x8xf32> to vector<2x8x2x8xf32>
    %c2_117 = arith.constant 2 : index
    %c4_118 = arith.constant 4 : index
    %c0_119 = arith.constant 0 : index
    %c0_120 = arith.constant 0 : index
    %218 = vector.load %arg1[%c2_117, %c4_118, %c0_119, %c0_120] : memref<7x7x2x1xf32, #tpu.memory_space<vmem>>, vector<1x1x2x1xf32>
    %219 = vector.shape_cast %218 : vector<1x1x2x1xf32> to vector<2x1xf32>
    %220 = vector.shape_cast %219 : vector<2x1xf32> to vector<1x1x2x1xf32>
    %221 = vector.broadcast %220 : vector<1x1x2x1xf32> to vector<2x8x2x8xf32>
    %222 = arith.mulf %217, %221 : vector<2x8x2x8xf32>
    %223 = arith.addf %216, %222 : vector<2x8x2x8xf32>
    %224 = vector.extract_strided_slice %202 {offsets = [0, 3, 0, 0], sizes = [2, 8, 2, 8], strides = [1, 1, 1, 1]} : vector<2x14x2x8xf32> to vector<2x8x2x8xf32>
    %c3_121 = arith.constant 3 : index
    %c4_122 = arith.constant 4 : index
    %c0_123 = arith.constant 0 : index
    %c0_124 = arith.constant 0 : index
    %225 = vector.load %arg1[%c3_121, %c4_122, %c0_123, %c0_124] : memref<7x7x2x1xf32, #tpu.memory_space<vmem>>, vector<1x1x2x1xf32>
    %226 = vector.shape_cast %225 : vector<1x1x2x1xf32> to vector<2x1xf32>
    %227 = vector.shape_cast %226 : vector<2x1xf32> to vector<1x1x2x1xf32>
    %228 = vector.broadcast %227 : vector<1x1x2x1xf32> to vector<2x8x2x8xf32>
    %229 = arith.mulf %224, %228 : vector<2x8x2x8xf32>
    %230 = arith.addf %223, %229 : vector<2x8x2x8xf32>
    %231 = vector.extract_strided_slice %202 {offsets = [0, 4, 0, 0], sizes = [2, 8, 2, 8], strides = [1, 1, 1, 1]} : vector<2x14x2x8xf32> to vector<2x8x2x8xf32>
    %c4_125 = arith.constant 4 : index
    %c4_126 = arith.constant 4 : index
    %c0_127 = arith.constant 0 : index
    %c0_128 = arith.constant 0 : index
    %232 = vector.load %arg1[%c4_125, %c4_126, %c0_127, %c0_128] : memref<7x7x2x1xf32, #tpu.memory_space<vmem>>, vector<1x1x2x1xf32>
    %233 = vector.shape_cast %232 : vector<1x1x2x1xf32> to vector<2x1xf32>
    %234 = vector.shape_cast %233 : vector<2x1xf32> to vector<1x1x2x1xf32>
    %235 = vector.broadcast %234 : vector<1x1x2x1xf32> to vector<2x8x2x8xf32>
    %236 = arith.mulf %231, %235 : vector<2x8x2x8xf32>
    %237 = arith.addf %230, %236 : vector<2x8x2x8xf32>
    %238 = vector.extract_strided_slice %202 {offsets = [0, 5, 0, 0], sizes = [2, 8, 2, 8], strides = [1, 1, 1, 1]} : vector<2x14x2x8xf32> to vector<2x8x2x8xf32>
    %c5_129 = arith.constant 5 : index
    %c4_130 = arith.constant 4 : index
    %c0_131 = arith.constant 0 : index
    %c0_132 = arith.constant 0 : index
    %239 = vector.load %arg1[%c5_129, %c4_130, %c0_131, %c0_132] : memref<7x7x2x1xf32, #tpu.memory_space<vmem>>, vector<1x1x2x1xf32>
    %240 = vector.shape_cast %239 : vector<1x1x2x1xf32> to vector<2x1xf32>
    %241 = vector.shape_cast %240 : vector<2x1xf32> to vector<1x1x2x1xf32>
    %242 = vector.broadcast %241 : vector<1x1x2x1xf32> to vector<2x8x2x8xf32>
    %243 = arith.mulf %238, %242 : vector<2x8x2x8xf32>
    %244 = arith.addf %237, %243 : vector<2x8x2x8xf32>
    %245 = vector.extract_strided_slice %202 {offsets = [0, 6, 0, 0], sizes = [2, 8, 2, 8], strides = [1, 1, 1, 1]} : vector<2x14x2x8xf32> to vector<2x8x2x8xf32>
    %c6_133 = arith.constant 6 : index
    %c4_134 = arith.constant 4 : index
    %c0_135 = arith.constant 0 : index
    %c0_136 = arith.constant 0 : index
    %246 = vector.load %arg1[%c6_133, %c4_134, %c0_135, %c0_136] : memref<7x7x2x1xf32, #tpu.memory_space<vmem>>, vector<1x1x2x1xf32>
    %247 = vector.shape_cast %246 : vector<1x1x2x1xf32> to vector<2x1xf32>
    %248 = vector.shape_cast %247 : vector<2x1xf32> to vector<1x1x2x1xf32>
    %249 = vector.broadcast %248 : vector<1x1x2x1xf32> to vector<2x8x2x8xf32>
    %250 = arith.mulf %245, %249 : vector<2x8x2x8xf32>
    %251 = arith.addf %244, %250 : vector<2x8x2x8xf32>
    %252 = vector.extract_strided_slice %0 {offsets = [0, 0, 0, 5], sizes = [2, 14, 2, 8], strides = [1, 1, 1, 1]} : vector<2x14x2x14xf32> to vector<2x14x2x8xf32>
    %253 = vector.extract_strided_slice %252 {offsets = [0, 0, 0, 0], sizes = [2, 8, 2, 8], strides = [1, 1, 1, 1]} : vector<2x14x2x8xf32> to vector<2x8x2x8xf32>
    %c0_137 = arith.constant 0 : index
    %c5_138 = arith.constant 5 : index
    %c0_139 = arith.constant 0 : index
    %c0_140 = arith.constant 0 : index
    %254 = vector.load %arg1[%c0_137, %c5_138, %c0_139, %c0_140] : memref<7x7x2x1xf32, #tpu.memory_space<vmem>>, vector<1x1x2x1xf32>
    %255 = vector.shape_cast %254 : vector<1x1x2x1xf32> to vector<2x1xf32>
    %256 = vector.shape_cast %255 : vector<2x1xf32> to vector<1x1x2x1xf32>
    %257 = vector.broadcast %256 : vector<1x1x2x1xf32> to vector<2x8x2x8xf32>
    %258 = arith.mulf %253, %257 : vector<2x8x2x8xf32>
    %259 = arith.addf %251, %258 : vector<2x8x2x8xf32>
    %260 = vector.extract_strided_slice %252 {offsets = [0, 1, 0, 0], sizes = [2, 8, 2, 8], strides = [1, 1, 1, 1]} : vector<2x14x2x8xf32> to vector<2x8x2x8xf32>
    %c1_141 = arith.constant 1 : index
    %c5_142 = arith.constant 5 : index
    %c0_143 = arith.constant 0 : index
    %c0_144 = arith.constant 0 : index
    %261 = vector.load %arg1[%c1_141, %c5_142, %c0_143, %c0_144] : memref<7x7x2x1xf32, #tpu.memory_space<vmem>>, vector<1x1x2x1xf32>
    %262 = vector.shape_cast %261 : vector<1x1x2x1xf32> to vector<2x1xf32>
    %263 = vector.shape_cast %262 : vector<2x1xf32> to vector<1x1x2x1xf32>
    %264 = vector.broadcast %263 : vector<1x1x2x1xf32> to vector<2x8x2x8xf32>
    %265 = arith.mulf %260, %264 : vector<2x8x2x8xf32>
    %266 = arith.addf %259, %265 : vector<2x8x2x8xf32>
    %267 = vector.extract_strided_slice %252 {offsets = [0, 2, 0, 0], sizes = [2, 8, 2, 8], strides = [1, 1, 1, 1]} : vector<2x14x2x8xf32> to vector<2x8x2x8xf32>
    %c2_145 = arith.constant 2 : index
    %c5_146 = arith.constant 5 : index
    %c0_147 = arith.constant 0 : index
    %c0_148 = arith.constant 0 : index
    %268 = vector.load %arg1[%c2_145, %c5_146, %c0_147, %c0_148] : memref<7x7x2x1xf32, #tpu.memory_space<vmem>>, vector<1x1x2x1xf32>
    %269 = vector.shape_cast %268 : vector<1x1x2x1xf32> to vector<2x1xf32>
    %270 = vector.shape_cast %269 : vector<2x1xf32> to vector<1x1x2x1xf32>
    %271 = vector.broadcast %270 : vector<1x1x2x1xf32> to vector<2x8x2x8xf32>
    %272 = arith.mulf %267, %271 : vector<2x8x2x8xf32>
    %273 = arith.addf %266, %272 : vector<2x8x2x8xf32>
    %274 = vector.extract_strided_slice %252 {offsets = [0, 3, 0, 0], sizes = [2, 8, 2, 8], strides = [1, 1, 1, 1]} : vector<2x14x2x8xf32> to vector<2x8x2x8xf32>
    %c3_149 = arith.constant 3 : index
    %c5_150 = arith.constant 5 : index
    %c0_151 = arith.constant 0 : index
    %c0_152 = arith.constant 0 : index
    %275 = vector.load %arg1[%c3_149, %c5_150, %c0_151, %c0_152] : memref<7x7x2x1xf32, #tpu.memory_space<vmem>>, vector<1x1x2x1xf32>
    %276 = vector.shape_cast %275 : vector<1x1x2x1xf32> to vector<2x1xf32>
    %277 = vector.shape_cast %276 : vector<2x1xf32> to vector<1x1x2x1xf32>
    %278 = vector.broadcast %277 : vector<1x1x2x1xf32> to vector<2x8x2x8xf32>
    %279 = arith.mulf %274, %278 : vector<2x8x2x8xf32>
    %280 = arith.addf %273, %279 : vector<2x8x2x8xf32>
    %281 = vector.extract_strided_slice %252 {offsets = [0, 4, 0, 0], sizes = [2, 8, 2, 8], strides = [1, 1, 1, 1]} : vector<2x14x2x8xf32> to vector<2x8x2x8xf32>
    %c4_153 = arith.constant 4 : index
    %c5_154 = arith.constant 5 : index
    %c0_155 = arith.constant 0 : index
    %c0_156 = arith.constant 0 : index
    %282 = vector.load %arg1[%c4_153, %c5_154, %c0_155, %c0_156] : memref<7x7x2x1xf32, #tpu.memory_space<vmem>>, vector<1x1x2x1xf32>
    %283 = vector.shape_cast %282 : vector<1x1x2x1xf32> to vector<2x1xf32>
    %284 = vector.shape_cast %283 : vector<2x1xf32> to vector<1x1x2x1xf32>
    %285 = vector.broadcast %284 : vector<1x1x2x1xf32> to vector<2x8x2x8xf32>
    %286 = arith.mulf %281, %285 : vector<2x8x2x8xf32>
    %287 = arith.addf %280, %286 : vector<2x8x2x8xf32>
    %288 = vector.extract_strided_slice %252 {offsets = [0, 5, 0, 0], sizes = [2, 8, 2, 8], strides = [1, 1, 1, 1]} : vector<2x14x2x8xf32> to vector<2x8x2x8xf32>
    %c5_157 = arith.constant 5 : index
    %c5_158 = arith.constant 5 : index
    %c0_159 = arith.constant 0 : index
    %c0_160 = arith.constant 0 : index
    %289 = vector.load %arg1[%c5_157, %c5_158, %c0_159, %c0_160] : memref<7x7x2x1xf32, #tpu.memory_space<vmem>>, vector<1x1x2x1xf32>
    %290 = vector.shape_cast %289 : vector<1x1x2x1xf32> to vector<2x1xf32>
    %291 = vector.shape_cast %290 : vector<2x1xf32> to vector<1x1x2x1xf32>
    %292 = vector.broadcast %291 : vector<1x1x2x1xf32> to vector<2x8x2x8xf32>
    %293 = arith.mulf %288, %292 : vector<2x8x2x8xf32>
    %294 = arith.addf %287, %293 : vector<2x8x2x8xf32>
    %295 = vector.extract_strided_slice %252 {offsets = [0, 6, 0, 0], sizes = [2, 8, 2, 8], strides = [1, 1, 1, 1]} : vector<2x14x2x8xf32> to vector<2x8x2x8xf32>
    %c6_161 = arith.constant 6 : index
    %c5_162 = arith.constant 5 : index
    %c0_163 = arith.constant 0 : index
    %c0_164 = arith.constant 0 : index
    %296 = vector.load %arg1[%c6_161, %c5_162, %c0_163, %c0_164] : memref<7x7x2x1xf32, #tpu.memory_space<vmem>>, vector<1x1x2x1xf32>
    %297 = vector.shape_cast %296 : vector<1x1x2x1xf32> to vector<2x1xf32>
    %298 = vector.shape_cast %297 : vector<2x1xf32> to vector<1x1x2x1xf32>
    %299 = vector.broadcast %298 : vector<1x1x2x1xf32> to vector<2x8x2x8xf32>
    %300 = arith.mulf %295, %299 : vector<2x8x2x8xf32>
    %301 = arith.addf %294, %300 : vector<2x8x2x8xf32>
    %302 = vector.extract_strided_slice %0 {offsets = [0, 0, 0, 6], sizes = [2, 14, 2, 8], strides = [1, 1, 1, 1]} : vector<2x14x2x14xf32> to vector<2x14x2x8xf32>
    %303 = vector.extract_strided_slice %302 {offsets = [0, 0, 0, 0], sizes = [2, 8, 2, 8], strides = [1, 1, 1, 1]} : vector<2x14x2x8xf32> to vector<2x8x2x8xf32>
    %c0_165 = arith.constant 0 : index
    %c6_166 = arith.constant 6 : index
    %c0_167 = arith.constant 0 : index
    %c0_168 = arith.constant 0 : index
    %304 = vector.load %arg1[%c0_165, %c6_166, %c0_167, %c0_168] : memref<7x7x2x1xf32, #tpu.memory_space<vmem>>, vector<1x1x2x1xf32>
    %305 = vector.shape_cast %304 : vector<1x1x2x1xf32> to vector<2x1xf32>
    %306 = vector.shape_cast %305 : vector<2x1xf32> to vector<1x1x2x1xf32>
    %307 = vector.broadcast %306 : vector<1x1x2x1xf32> to vector<2x8x2x8xf32>
    %308 = arith.mulf %303, %307 : vector<2x8x2x8xf32>
    %309 = arith.addf %301, %308 : vector<2x8x2x8xf32>
    %310 = vector.extract_strided_slice %302 {offsets = [0, 1, 0, 0], sizes = [2, 8, 2, 8], strides = [1, 1, 1, 1]} : vector<2x14x2x8xf32> to vector<2x8x2x8xf32>
    %c1_169 = arith.constant 1 : index
    %c6_170 = arith.constant 6 : index
    %c0_171 = arith.constant 0 : index
    %c0_172 = arith.constant 0 : index
    %311 = vector.load %arg1[%c1_169, %c6_170, %c0_171, %c0_172] : memref<7x7x2x1xf32, #tpu.memory_space<vmem>>, vector<1x1x2x1xf32>
    %312 = vector.shape_cast %311 : vector<1x1x2x1xf32> to vector<2x1xf32>
    %313 = vector.shape_cast %312 : vector<2x1xf32> to vector<1x1x2x1xf32>
    %314 = vector.broadcast %313 : vector<1x1x2x1xf32> to vector<2x8x2x8xf32>
    %315 = arith.mulf %310, %314 : vector<2x8x2x8xf32>
    %316 = arith.addf %309, %315 : vector<2x8x2x8xf32>
    %317 = vector.extract_strided_slice %302 {offsets = [0, 2, 0, 0], sizes = [2, 8, 2, 8], strides = [1, 1, 1, 1]} : vector<2x14x2x8xf32> to vector<2x8x2x8xf32>
    %c2_173 = arith.constant 2 : index
    %c6_174 = arith.constant 6 : index
    %c0_175 = arith.constant 0 : index
    %c0_176 = arith.constant 0 : index
    %318 = vector.load %arg1[%c2_173, %c6_174, %c0_175, %c0_176] : memref<7x7x2x1xf32, #tpu.memory_space<vmem>>, vector<1x1x2x1xf32>
    %319 = vector.shape_cast %318 : vector<1x1x2x1xf32> to vector<2x1xf32>
    %320 = vector.shape_cast %319 : vector<2x1xf32> to vector<1x1x2x1xf32>
    %321 = vector.broadcast %320 : vector<1x1x2x1xf32> to vector<2x8x2x8xf32>
    %322 = arith.mulf %317, %321 : vector<2x8x2x8xf32>
    %323 = arith.addf %316, %322 : vector<2x8x2x8xf32>
    %324 = vector.extract_strided_slice %302 {offsets = [0, 3, 0, 0], sizes = [2, 8, 2, 8], strides = [1, 1, 1, 1]} : vector<2x14x2x8xf32> to vector<2x8x2x8xf32>
    %c3_177 = arith.constant 3 : index
    %c6_178 = arith.constant 6 : index
    %c0_179 = arith.constant 0 : index
    %c0_180 = arith.constant 0 : index
    %325 = vector.load %arg1[%c3_177, %c6_178, %c0_179, %c0_180] : memref<7x7x2x1xf32, #tpu.memory_space<vmem>>, vector<1x1x2x1xf32>
    %326 = vector.shape_cast %325 : vector<1x1x2x1xf32> to vector<2x1xf32>
    %327 = vector.shape_cast %326 : vector<2x1xf32> to vector<1x1x2x1xf32>
    %328 = vector.broadcast %327 : vector<1x1x2x1xf32> to vector<2x8x2x8xf32>
    %329 = arith.mulf %324, %328 : vector<2x8x2x8xf32>
    %330 = arith.addf %323, %329 : vector<2x8x2x8xf32>
    %331 = vector.extract_strided_slice %302 {offsets = [0, 4, 0, 0], sizes = [2, 8, 2, 8], strides = [1, 1, 1, 1]} : vector<2x14x2x8xf32> to vector<2x8x2x8xf32>
    %c4_181 = arith.constant 4 : index
    %c6_182 = arith.constant 6 : index
    %c0_183 = arith.constant 0 : index
    %c0_184 = arith.constant 0 : index
    %332 = vector.load %arg1[%c4_181, %c6_182, %c0_183, %c0_184] : memref<7x7x2x1xf32, #tpu.memory_space<vmem>>, vector<1x1x2x1xf32>
    %333 = vector.shape_cast %332 : vector<1x1x2x1xf32> to vector<2x1xf32>
    %334 = vector.shape_cast %333 : vector<2x1xf32> to vector<1x1x2x1xf32>
    %335 = vector.broadcast %334 : vector<1x1x2x1xf32> to vector<2x8x2x8xf32>
    %336 = arith.mulf %331, %335 : vector<2x8x2x8xf32>
    %337 = arith.addf %330, %336 : vector<2x8x2x8xf32>
    %338 = vector.extract_strided_slice %302 {offsets = [0, 5, 0, 0], sizes = [2, 8, 2, 8], strides = [1, 1, 1, 1]} : vector<2x14x2x8xf32> to vector<2x8x2x8xf32>
    %c5_185 = arith.constant 5 : index
    %c6_186 = arith.constant 6 : index
    %c0_187 = arith.constant 0 : index
    %c0_188 = arith.constant 0 : index
    %339 = vector.load %arg1[%c5_185, %c6_186, %c0_187, %c0_188] : memref<7x7x2x1xf32, #tpu.memory_space<vmem>>, vector<1x1x2x1xf32>
    %340 = vector.shape_cast %339 : vector<1x1x2x1xf32> to vector<2x1xf32>
    %341 = vector.shape_cast %340 : vector<2x1xf32> to vector<1x1x2x1xf32>
    %342 = vector.broadcast %341 : vector<1x1x2x1xf32> to vector<2x8x2x8xf32>
    %343 = arith.mulf %338, %342 : vector<2x8x2x8xf32>
    %344 = arith.addf %337, %343 : vector<2x8x2x8xf32>
    %345 = vector.extract_strided_slice %302 {offsets = [0, 6, 0, 0], sizes = [2, 8, 2, 8], strides = [1, 1, 1, 1]} : vector<2x14x2x8xf32> to vector<2x8x2x8xf32>
    %c6_189 = arith.constant 6 : index
    %c6_190 = arith.constant 6 : index
    %c0_191 = arith.constant 0 : index
    %c0_192 = arith.constant 0 : index
    %346 = vector.load %arg1[%c6_189, %c6_190, %c0_191, %c0_192] : memref<7x7x2x1xf32, #tpu.memory_space<vmem>>, vector<1x1x2x1xf32>
    %347 = vector.shape_cast %346 : vector<1x1x2x1xf32> to vector<2x1xf32>
    %348 = vector.shape_cast %347 : vector<2x1xf32> to vector<1x1x2x1xf32>
    %349 = vector.broadcast %348 : vector<1x1x2x1xf32> to vector<2x8x2x8xf32>
    %350 = arith.mulf %345, %349 : vector<2x8x2x8xf32>
    %351 = arith.addf %344, %350 : vector<2x8x2x8xf32>
    %cst_193 = arith.constant dense<0.000000e+00> : vector<2x8x8xf32>
    %352 = vector.multi_reduction <add>, %351, %cst_193 [2] : vector<2x8x2x8xf32> to vector<2x8x8xf32>
    %353 = arith.negf %352 : vector<2x8x8xf32>
    %354 = math.exp %353 : vector<2x8x8xf32>
    %cst_194 = arith.constant 1.000000e+00 : f32
    %355 = vector.broadcast %cst_194 : f32 to vector<2x8x8xf32>
    %356 = arith.addf %355, %354 : vector<2x8x8xf32>
    %357 = arith.divf %355, %356 : vector<2x8x8xf32>
    %c0_195 = arith.constant 0 : index
    %c0_196 = arith.constant 0 : index
    %c0_197 = arith.constant 0 : index
    %358 = vector.load %arg2[%c0_195, %c0_196, %c0_197] : memref<2x8x8xf32, #tpu.memory_space<vmem>>, vector<2x8x8xf32>
    tpu.vector_store %arg2[%c0_195, %c0_196, %c0_197], %357 {strides = array<i32>} : memref<2x8x8xf32, #tpu.memory_space<vmem>>, vector<2x8x8xf32>,
    return
  }
}

module attributes {stable_mosaic.version = 11 : i64} {
  func.func @cross_attn_kernel(%arg0: i32, %arg1: i32, %arg2: memref<1x1x64x8xf32, #tpu.memory_space<vmem>>, %arg3: memref<1x1x64x8xf32, #tpu.memory_space<vmem>>, %arg4: memref<1x8x8xbf16, #tpu.memory_space<vmem>>, %arg5: memref<1x1x8xf32, #tpu.memory_space<vmem>>, %arg6: memref<1x8x16xbf16, #tpu.memory_space<vmem>>, %arg7: memref<1x1x16xf32, #tpu.memory_space<vmem>>, %arg8: memref<1x1x64x8xf32, #tpu.memory_space<vmem>>) attributes {dimension_semantics = [#tpu.dimension_semantics<parallel>, #tpu.dimension_semantics<parallel>], iteration_bounds = array<i64: 2, 2>, scalar_prefetch = 0 : i64, scratch_operands = 0 : i64, tpu.core_type = #tpu.core_type<tc>, window_params = [{transform_indices = @transform_0, window_bounds = array<i64: 1, 1, 64, 8>}, {transform_indices = @transform_1, window_bounds = array<i64: 1, 1, 64, 8>}, {transform_indices = @transform_2, window_bounds = array<i64: 1, 8, 8>}, {transform_indices = @transform_3, window_bounds = array<i64: 1, 1, 8>}, {transform_indices = @transform_4, window_bounds = array<i64: 1, 8, 16>}, {transform_indices = @transform_5, window_bounds = array<i64: 1, 1, 16>}, {transform_indices = @transform_6, window_bounds = array<i64: 1, 1, 64, 8>}]} {
    %c0 = arith.constant 0 : index
    %c0_0 = arith.constant 0 : index
    %c0_1 = arith.constant 0 : index
    %c0_2 = arith.constant 0 : index
    %0 = vector.load %arg2[%c0, %c0_0, %c0_1, %c0_2] : memref<1x1x64x8xf32, #tpu.memory_space<vmem>>, vector<1x1x64x8xf32>
    %1 = vector.shape_cast %0 : vector<1x1x64x8xf32> to vector<64x8xf32>
    %2 = arith.truncf %1 : vector<64x8xf32> to vector<64x8xbf16>
    %c0_3 = arith.constant 0 : index
    %c0_4 = arith.constant 0 : index
    %c0_5 = arith.constant 0 : index
    %c0_6 = arith.constant 0 : index
    %3 = vector.load %arg3[%c0_3, %c0_4, %c0_5, %c0_6] : memref<1x1x64x8xf32, #tpu.memory_space<vmem>>, vector<1x1x64x8xf32>
    %4 = vector.shape_cast %3 : vector<1x1x64x8xf32> to vector<64x8xf32>
    %5 = arith.truncf %4 : vector<64x8xf32> to vector<64x8xbf16>
    %c0_7 = arith.constant 0 : index
    %c0_8 = arith.constant 0 : index
    %c0_9 = arith.constant 0 : index
    %6 = vector.load %arg4[%c0_7, %c0_8, %c0_9] : memref<1x8x8xbf16, #tpu.memory_space<vmem>>, vector<1x8x8xbf16>
    %7 = vector.shape_cast %6 : vector<1x8x8xbf16> to vector<8x8xbf16>
    %cst = arith.constant dense<0.000000e+00> : vector<64x8xf32>
    %8 = tpu.matmul %2, %7, %cst {dimension_numbers = #tpu.dot_dimension_numbers<[1], [0], [0], [1], [0, 0, 1, 1], [], []>} : vector<64x8xbf16>, vector<8x8xbf16>, vector<64x8xf32> -> vector<64x8xf32>
    %c0_10 = arith.constant 0 : index
    %c0_11 = arith.constant 0 : index
    %c0_12 = arith.constant 0 : index
    %9 = vector.load %arg5[%c0_10, %c0_11, %c0_12] : memref<1x1x8xf32, #tpu.memory_space<vmem>>, vector<1x1x8xf32>
    %10 = vector.shape_cast %9 : vector<1x1x8xf32> to vector<1x8xf32>
    %11 = vector.broadcast %10 : vector<1x8xf32> to vector<64x8xf32>
    %12 = arith.addf %8, %11 : vector<64x8xf32>
    %c0_13 = arith.constant 0 : index
    %c0_14 = arith.constant 0 : index
    %c0_15 = arith.constant 0 : index
    %13 = vector.load %arg6[%c0_13, %c0_14, %c0_15] : memref<1x8x16xbf16, #tpu.memory_space<vmem>>, vector<1x8x16xbf16>
    %14 = vector.shape_cast %13 : vector<1x8x16xbf16> to vector<8x16xbf16>
    %cst_16 = arith.constant dense<0.000000e+00> : vector<64x16xf32>
    %15 = tpu.matmul %5, %14, %cst_16 {dimension_numbers = #tpu.dot_dimension_numbers<[1], [0], [0], [1], [0, 0, 1, 1], [], []>} : vector<64x8xbf16>, vector<8x16xbf16>, vector<64x16xf32> -> vector<64x16xf32>
    %c0_17 = arith.constant 0 : index
    %c0_18 = arith.constant 0 : index
    %c0_19 = arith.constant 0 : index
    %16 = vector.load %arg7[%c0_17, %c0_18, %c0_19] : memref<1x1x16xf32, #tpu.memory_space<vmem>>, vector<1x1x16xf32>
    %17 = vector.shape_cast %16 : vector<1x1x16xf32> to vector<1x16xf32>
    %18 = vector.broadcast %17 : vector<1x16xf32> to vector<64x16xf32>
    %19 = arith.addf %15, %18 : vector<64x16xf32>
    %20 = vector.extract_strided_slice %19 {offsets = [0, 0], sizes = [64, 8], strides = [1, 1]} : vector<64x16xf32> to vector<64x8xf32>
    %21 = vector.extract_strided_slice %19 {offsets = [0, 8], sizes = [64, 8], strides = [1, 1]} : vector<64x16xf32> to vector<64x8xf32>
    %22 = arith.truncf %12 : vector<64x8xf32> to vector<64x8xbf16>
    %23 = arith.truncf %20 : vector<64x8xf32> to vector<64x8xbf16>
    %cst_20 = arith.constant dense<0.000000e+00> : vector<64x64xf32>
    %24 = tpu.matmul %22, %23, %cst_20 {dimension_numbers = #tpu.dot_dimension_numbers<[1], [1], [0], [0], [0, 0, 1, 0], [], []>} : vector<64x8xbf16>, vector<64x8xbf16>, vector<64x64xf32> -> vector<64x64xf32>
    %cst_21 = arith.constant dense<0xFF800000> : vector<64xf32>
    %25 = vector.multi_reduction <maximumf>, %24, %cst_21 [1] : vector<64x64xf32> to vector<64xf32>
    %26 = vector.shape_cast %25 : vector<64xf32> to vector<64x1xf32>
    %27 = vector.broadcast %26 : vector<64x1xf32> to vector<64x64xf32>
    %28 = arith.subf %24, %27 : vector<64x64xf32>
    %29 = math.exp %28 : vector<64x64xf32>
    %cst_22 = arith.constant dense<0.000000e+00> : vector<64xf32>
    %30 = vector.multi_reduction <add>, %29, %cst_22 [1] : vector<64x64xf32> to vector<64xf32>
    %31 = vector.shape_cast %30 : vector<64xf32> to vector<64x1xf32>
    %32 = tpu.reciprocal %31 {approx = true} : vector<64x1xf32> -> vector<64x1xf32>
    %33 = vector.broadcast %32 : vector<64x1xf32> to vector<64x64xf32>
    %34 = arith.mulf %29, %33 : vector<64x64xf32>
    %35 = arith.truncf %34 : vector<64x64xf32> to vector<64x64xbf16>
    %36 = arith.truncf %21 : vector<64x8xf32> to vector<64x8xbf16>
    %cst_23 = arith.constant dense<0.000000e+00> : vector<64x8xf32>
    %37 = tpu.matmul %35, %36, %cst_23 {dimension_numbers = #tpu.dot_dimension_numbers<[1], [0], [0], [1], [0, 0, 1, 1], [], []>} : vector<64x64xbf16>, vector<64x8xbf16>, vector<64x8xf32> -> vector<64x8xf32>
    %c0_24 = arith.constant 0 : index
    %c0_25 = arith.constant 0 : index
    %c0_26 = arith.constant 0 : index
    %c0_27 = arith.constant 0 : index
    %38 = vector.load %arg8[%c0_24, %c0_25, %c0_26, %c0_27] : memref<1x1x64x8xf32, #tpu.memory_space<vmem>>, vector<1x1x64x8xf32>
    %39 = vector.shape_cast %38 : vector<1x1x64x8xf32> to vector<64x8xf32>
    %40 = vector.shape_cast %37 : vector<64x8xf32> to vector<1x1x64x8xf32>
    tpu.vector_store %arg8[%c0_24, %c0_25, %c0_26, %c0_27], %40 {strides = array<i32>} : memref<1x1x64x8xf32, #tpu.memory_space<vmem>>, vector<1x1x64x8xf32>,
    return
  }
  func.func @transform_0(%arg0: i32, %arg1: i32) -> (i32, i32, i32, i32) {
    %c0_i32 = arith.constant 0 : i32
    %c0_i32_0 = arith.constant 0 : i32
    %c0_i32_1 = arith.constant 0 : i32
    return %arg0, %arg1, %c0_i32, %c0_i32_0 : i32, i32, i32, i32
  }
  func.func @transform_1(%arg0: i32, %arg1: i32) -> (i32, i32, i32, i32) {
    %c0_i32 = arith.constant 0 : i32
    %c0_i32_0 = arith.constant 0 : i32
    %c0_i32_1 = arith.constant 0 : i32
    return %arg0, %arg1, %c0_i32, %c0_i32_0 : i32, i32, i32, i32
  }
  func.func @transform_2(%arg0: i32, %arg1: i32) -> (i32, i32, i32) {
    %c0_i32 = arith.constant 0 : i32
    %c0_i32_0 = arith.constant 0 : i32
    %c0_i32_1 = arith.constant 0 : i32
    return %arg0, %c0_i32, %c0_i32_0 : i32, i32, i32
  }
  func.func @transform_3(%arg0: i32, %arg1: i32) -> (i32, i32, i32) {
    %c0_i32 = arith.constant 0 : i32
    %c0_i32_0 = arith.constant 0 : i32
    %c0_i32_1 = arith.constant 0 : i32
    return %arg0, %c0_i32, %c0_i32_0 : i32, i32, i32
  }
  func.func @transform_4(%arg0: i32, %arg1: i32) -> (i32, i32, i32) {
    %c0_i32 = arith.constant 0 : i32
    %c0_i32_0 = arith.constant 0 : i32
    %c0_i32_1 = arith.constant 0 : i32
    return %arg0, %c0_i32, %c0_i32_0 : i32, i32, i32
  }
  func.func @transform_5(%arg0: i32, %arg1: i32) -> (i32, i32, i32) {
    %c0_i32 = arith.constant 0 : i32
    %c0_i32_0 = arith.constant 0 : i32
    %c0_i32_1 = arith.constant 0 : i32
    return %arg0, %c0_i32, %c0_i32_0 : i32, i32, i32
  }
  func.func @transform_6(%arg0: i32, %arg1: i32) -> (i32, i32, i32, i32) {
    %c0_i32 = arith.constant 0 : i32
    %c0_i32_0 = arith.constant 0 : i32
    %c0_i32_1 = arith.constant 0 : i32
    return %arg0, %arg1, %c0_i32, %c0_i32_0 : i32, i32, i32, i32
  }
}

module attributes {stable_mosaic.version = 11 : i64} {
  func.func @epilogue_kernel(%arg0: i32, %arg1: memref<2x512x8xf32, #tpu.memory_space<vmem>>, %arg2: memref<2x512x32xf32, #tpu.memory_space<vmem>>, %arg3: memref<4x8x32xbf16, #tpu.memory_space<vmem>>, %arg4: memref<2x512x32xf32, #tpu.memory_space<vmem>>) attributes {dimension_semantics = [#tpu.dimension_semantics<parallel>], iteration_bounds = array<i64: 1>, scalar_prefetch = 0 : i64, scratch_operands = 0 : i64, tpu.core_type = #tpu.core_type<tc>, window_params = [{transform_indices = @transform_0, window_bounds = array<i64: 2, 512, 8>}, {transform_indices = @transform_1, window_bounds = array<i64: 2, 512, 32>}, {pipeline_mode = #tpu.pipeline_mode<synchronous>, transform_indices = @transform_2, window_bounds = array<i64: 4, 8, 32>}, {transform_indices = @transform_3, window_bounds = array<i64: 2, 512, 32>}]} {
    %c0 = arith.constant 0 : index
    %c0_0 = arith.constant 0 : index
    %c0_1 = arith.constant 0 : index
    %0 = vector.load %arg1[%c0, %c0_0, %c0_1] : memref<2x512x8xf32, #tpu.memory_space<vmem>>, vector<1x512x8xf32>
    %1 = vector.shape_cast %0 : vector<1x512x8xf32> to vector<512x8xf32>
    %2 = arith.truncf %1 : vector<512x8xf32> to vector<512x8xbf16>
    %c1 = arith.constant 1 : index
    %c0_2 = arith.constant 0 : index
    %c0_3 = arith.constant 0 : index
    %3 = vector.load %arg1[%c1, %c0_2, %c0_3] : memref<2x512x8xf32, #tpu.memory_space<vmem>>, vector<1x512x8xf32>
    %4 = vector.shape_cast %3 : vector<1x512x8xf32> to vector<512x8xf32>
    %5 = arith.truncf %4 : vector<512x8xf32> to vector<512x8xbf16>
    %c0_4 = arith.constant 0 : index
    %c0_5 = arith.constant 0 : index
    %c0_6 = arith.constant 0 : index
    %6 = vector.load %arg2[%c0_4, %c0_5, %c0_6] : memref<2x512x32xf32, #tpu.memory_space<vmem>>, vector<1x512x32xf32>
    %7 = vector.shape_cast %6 : vector<1x512x32xf32> to vector<512x32xf32>
    %c0_7 = arith.constant 0 : index
    %c0_8 = arith.constant 0 : index
    %c0_9 = arith.constant 0 : index
    %8 = vector.load %arg3[%c0_7, %c0_8, %c0_9] : memref<4x8x32xbf16, #tpu.memory_space<vmem>>, vector<1x8x32xbf16>
    %9 = vector.shape_cast %8 : vector<1x8x32xbf16> to vector<8x32xbf16>
    %cst = arith.constant dense<0.000000e+00> : vector<512x32xf32>
    %10 = tpu.matmul %2, %9, %cst {dimension_numbers = #tpu.dot_dimension_numbers<[1], [0], [0], [1], [0, 0, 1, 1], [], []>} : vector<512x8xbf16>, vector<8x32xbf16>, vector<512x32xf32> -> vector<512x32xf32>
    %c1_10 = arith.constant 1 : index
    %c0_11 = arith.constant 0 : index
    %c0_12 = arith.constant 0 : index
    %11 = vector.load %arg3[%c1_10, %c0_11, %c0_12] : memref<4x8x32xbf16, #tpu.memory_space<vmem>>, vector<1x8x32xbf16>
    %12 = vector.shape_cast %11 : vector<1x8x32xbf16> to vector<8x32xbf16>
    %cst_13 = arith.constant dense<0.000000e+00> : vector<512x32xf32>
    %13 = tpu.matmul %5, %12, %cst_13 {dimension_numbers = #tpu.dot_dimension_numbers<[1], [0], [0], [1], [0, 0, 1, 1], [], []>} : vector<512x8xbf16>, vector<8x32xbf16>, vector<512x32xf32> -> vector<512x32xf32>
    %14 = arith.addf %10, %13 : vector<512x32xf32>
    %15 = arith.addf %7, %14 : vector<512x32xf32>
    %c0_14 = arith.constant 0 : index
    %c0_15 = arith.constant 0 : index
    %c0_16 = arith.constant 0 : index
    %16 = vector.load %arg4[%c0_14, %c0_15, %c0_16] : memref<2x512x32xf32, #tpu.memory_space<vmem>>, vector<1x512x32xf32>
    %17 = vector.shape_cast %16 : vector<1x512x32xf32> to vector<512x32xf32>
    %18 = vector.shape_cast %15 : vector<512x32xf32> to vector<1x512x32xf32>
    tpu.vector_store %arg4[%c0_14, %c0_15, %c0_16], %18 {strides = array<i32>} : memref<2x512x32xf32, #tpu.memory_space<vmem>>, vector<1x512x32xf32>,
    %c1_17 = arith.constant 1 : index
    %c0_18 = arith.constant 0 : index
    %c0_19 = arith.constant 0 : index
    %19 = vector.load %arg2[%c1_17, %c0_18, %c0_19] : memref<2x512x32xf32, #tpu.memory_space<vmem>>, vector<1x512x32xf32>
    %20 = vector.shape_cast %19 : vector<1x512x32xf32> to vector<512x32xf32>
    %c3 = arith.constant 3 : index
    %c0_20 = arith.constant 0 : index
    %c0_21 = arith.constant 0 : index
    %21 = vector.load %arg3[%c3, %c0_20, %c0_21] : memref<4x8x32xbf16, #tpu.memory_space<vmem>>, vector<1x8x32xbf16>
    %22 = vector.shape_cast %21 : vector<1x8x32xbf16> to vector<8x32xbf16>
    %cst_22 = arith.constant dense<0.000000e+00> : vector<512x32xf32>
    %23 = tpu.matmul %5, %22, %cst_22 {dimension_numbers = #tpu.dot_dimension_numbers<[1], [0], [0], [1], [0, 0, 1, 1], [], []>} : vector<512x8xbf16>, vector<8x32xbf16>, vector<512x32xf32> -> vector<512x32xf32>
    %c2 = arith.constant 2 : index
    %c0_23 = arith.constant 0 : index
    %c0_24 = arith.constant 0 : index
    %24 = vector.load %arg3[%c2, %c0_23, %c0_24] : memref<4x8x32xbf16, #tpu.memory_space<vmem>>, vector<1x8x32xbf16>
    %25 = vector.shape_cast %24 : vector<1x8x32xbf16> to vector<8x32xbf16>
    %cst_25 = arith.constant dense<0.000000e+00> : vector<512x32xf32>
    %26 = tpu.matmul %2, %25, %cst_25 {dimension_numbers = #tpu.dot_dimension_numbers<[1], [0], [0], [1], [0, 0, 1, 1], [], []>} : vector<512x8xbf16>, vector<8x32xbf16>, vector<512x32xf32> -> vector<512x32xf32>
    %27 = arith.addf %23, %26 : vector<512x32xf32>
    %28 = arith.addf %20, %27 : vector<512x32xf32>
    %c1_26 = arith.constant 1 : index
    %c0_27 = arith.constant 0 : index
    %c0_28 = arith.constant 0 : index
    %29 = vector.load %arg4[%c1_26, %c0_27, %c0_28] : memref<2x512x32xf32, #tpu.memory_space<vmem>>, vector<1x512x32xf32>
    %30 = vector.shape_cast %29 : vector<1x512x32xf32> to vector<512x32xf32>
    %31 = vector.shape_cast %28 : vector<512x32xf32> to vector<1x512x32xf32>
    tpu.vector_store %arg4[%c1_26, %c0_27, %c0_28], %31 {strides = array<i32>} : memref<2x512x32xf32, #tpu.memory_space<vmem>>, vector<1x512x32xf32>,
    return
  }
  func.func @transform_0(%arg0: i32) -> (i32, i32, i32) {
    %c0_i32 = arith.constant 0 : i32
    %c0_i32_0 = arith.constant 0 : i32
    %c0_i32_1 = arith.constant 0 : i32
    return %c0_i32, %arg0, %c0_i32_0 : i32, i32, i32
  }
  func.func @transform_1(%arg0: i32) -> (i32, i32, i32) {
    %c0_i32 = arith.constant 0 : i32
    %c0_i32_0 = arith.constant 0 : i32
    %c0_i32_1 = arith.constant 0 : i32
    return %c0_i32, %arg0, %c0_i32_0 : i32, i32, i32
  }
  func.func @transform_2(%arg0: i32) -> (i32, i32, i32) {
    %c0_i32 = arith.constant 0 : i32
    %c0_i32_0 = arith.constant 0 : i32
    %c0_i32_1 = arith.constant 0 : i32
    %c0_i32_2 = arith.constant 0 : i32
    return %c0_i32, %c0_i32_0, %c0_i32_1 : i32, i32, i32
  }
  func.func @transform_3(%arg0: i32) -> (i32, i32, i32) {
    %c0_i32 = arith.constant 0 : i32
    %c0_i32_0 = arith.constant 0 : i32
    %c0_i32_1 = arith.constant 0 : i32
    return %c0_i32, %arg0, %c0_i32_0 : i32, i32, i32
  }
}

</mosaic_0001>

<bundles_post_ra>
// kernel: mul.49
= control target key start
LH: loop header
LB: loop body
LE: loop exit
PB: predicated region body
PF: predicated region fallthrough
CT: control target
= control target key end

     0   :  { %3 = vsyncpa [#allocation1], 0  ;;  %s148_s0 = inlined_call_operand.hbm [shape: f32[2,8,8], index: 0, kind: input, shape index: {}, may-alias: {0,1}]   ;;  %s149_s1 = inlined_call_operand.hbm [shape: f32[2,8,8], index: 1, kind: input, shape index: {}, may-alias: {0,1}]   ;;  %s150_s2 = inlined_call_operand.vmem [shape: f32[2,8,8], index: 2, kind: output, shape index: {}]  }
   0x1   :  { %4 = vsyncpa [#allocation3], 0  ;;  %s99_s9 = smov [#allocation0]   ;;  %s51_s13 = scalar_lea.hbm %s148_s0, 256 }
   0x2   :  { %s8_s10 = sshll.u32 %s99_s9, 4  ;;  %p52_p0 = scmp.ne.s32.totalorder %s148_s0, %s51_s13  ;;  %s9_s10 = int_to_ptr.vmem [resolvable:$true] %s8_s10 }
   0x3   :  { %p55_p1 = scmp.lt.u32.totalorder %s51_s13, %s148_s0 }
   0x5   :  { %p57_p2 = pnand %p55_p1, %p52_p0 }
   0x7   :  { %60 = shalt.err (!%p57_p2)
}
   0x8   :  { %s61_s18 = scalar_lea.vmem %s9_s10, 256  ;;  %p66_p4 = scmp.lt.s32.totalorder %s9_s10, %s9_s10 }
   0x9   :  { %p62_p3 = scmp.ne.s32.totalorder %s9_s10, %s61_s18  ;;  %p67_p5 = scmp.lt.s32.totalorder %s61_s18, %s61_s18 }
   0xb   :  { %p68_p6 = por %p67_p5, %p66_p4 }
   0xd   :  { %p69_p7 = pnand %p68_p6, %p62_p3 }
   0xf   :  { %72 = shalt.err (!%p69_p7)
}
  0x10   :  { %s100_s19 = smov 128   ;;  %s101_s20 = smov 8  }
  0x11   :  { %14 = dma.hbm_to_vmem [thread:$0]  %s148_s0, 256, %s9_s10, [#allocation1], %s100_s19, %s100_s19, %s101_s20  }
  0x12   :  { %s102_s0 = smov [#allocation2]   ;;  %s73_s26 = scalar_lea.hbm %s149_s1, 256 }
  0x13   :  { %s18_s23 = sshll.u32 %s102_s0, 4  ;;  %p74_p8 = scmp.ne.s32.totalorder %s149_s1, %s73_s26  ;;  %s19_s23 = int_to_ptr.vmem [resolvable:$true] %s18_s23 }
  0x14   :  { %p77_p9 = scmp.lt.u32.totalorder %s73_s26, %s149_s1 }
  0x16   :  { %p79_p10 = pnand %p77_p9, %p74_p8 }
  0x18   :  { %82 = shalt.err (!%p79_p10)
}
  0x19   :  { %s83_s3 = scalar_lea.vmem %s19_s23, 256  ;;  %p88_p12 = scmp.lt.s32.totalorder %s19_s23, %s19_s23 }
  0x1a   :  { %p84_p11 = scmp.ne.s32.totalorder %s19_s23, %s83_s3  ;;  %p89_p13 = scmp.lt.s32.totalorder %s83_s3, %s83_s3 }
  0x1c   :  { %p90_p0 = por %p89_p13, %p88_p12 }
  0x1e   :  { %p91_p1 = pnand %p90_p0, %p84_p11 }
  0x20   :  { %94 = shalt.err (!%p91_p1)
}
  0x21   :  { %24 = dma.hbm_to_vmem [thread:$0]  %s149_s1, 256, %s19_s23, [#allocation3], %s100_s19, %s100_s19, %s101_s20  }
  0x22   :  { %95 = dma.done.wait [#allocation1], 256  }
  0x23   :  { %96 = vsyncadd [#allocation1], 4294967040 }
  0x24   :  { %97 = dma.done.wait [#allocation3], 256  }
  0x25   :  { %98 = vsyncadd [#allocation3], 4294967040  ;;  %v27_v0 = vld [vmem:[#allocation0] sm:$0xff]  ;;  %v28_v1 = vld [vmem:[#allocation2] sm:$0xff] }
  0x26   :  { %v35_v2 = vld [vmem:[#allocation0 + $0x8] sm:$0xff]  ;;  %v31_v3 = vmul.f32 %v28_v1, %v27_v0  ;;  %v37_v4 = vld [vmem:[#allocation2 + $0x8] sm:$0xff] }
  0x27   :  { %v40_v5 = vmul.f32 %v37_v4, %v35_v2 }
  0x28   :  { %33 = vst [vmem:[%s150_s2] sm:$0xff] %v31_v3 }
  0x29   :  { %46 = vst [vmem:[%s150_s2 + $0x8] sm:$0xff] %v40_v5 }
  0x2a   :  { %44 = vsyncpa [#allocation1], 1 }
  0x2b   :  { %45 = vsyncpa [#allocation3], 1 }

</bundles_post_ra>
